<compile_context>
chip_gen: v7x
topology: tpu7x:2x2x1
jax: 0.10.0
libtpu: 0.0.40
codegen_flags: <defaults>
</compile_context>

<pallas_src>
import math

import jax
import jax.numpy as jnp
from jax import lax
from jax.experimental import pallas as pl
from jax.experimental.pallas import tpu as pltpu

# ----------------------------- config ---------------------------------------
VOCAB = 64
BLOCK_SIZE = 16          # max context
N_LAYER = 2
N_HEAD = 2
N_EMBD = 32
HEAD_DIM = N_EMBD // N_HEAD
LN_EPS = 1e-5
V_PAD = 128              # lm_head output padded to a full 128-lane slab
SMALL_W = 4 * N_EMBD     # width of the consolidated small-vector slab (=128)
NEG_INF = -1e30          # finite mask value (exp() of it is exactly 0, no NaN)


# ----------------------------- kernel helpers --------------------------------
def _layernorm(x, w, b):
    # x: (M, C); w, b: (1, C).  F.layer_norm uses biased variance, eps=1e-5.
    mu = jnp.mean(x, axis=-1, keepdims=True)
    var = jnp.mean((x - mu) ** 2, axis=-1, keepdims=True)
    return (x - mu) * lax.rsqrt(var + LN_EPS) * w + b


def _gelu_exact(x):
    # nn.GELU() default = exact erf-based GELU (keeps module semantics).
    return 0.5 * x * (1.0 + lax.erf(x / math.sqrt(2.0)))


# ----------------------------- fused forward kernel --------------------------
def fused_forward_kernel(onehot_ref, wte_ref, pos_ref, bias_ref, smalls_ref,
                         wqkv_ref, wproj_ref, wfc_ref, wpr2_ref, wlm_ref,
                         o_ref):
    C, H, D = N_EMBD, N_HEAD, HEAD_DIM

    # --- embeddings: token one-hot gather on the MXU + positional add --------
    x = jnp.dot(onehot_ref[...], wte_ref[...],
                preferred_element_type=jnp.float32) + pos_ref[...]        # (M, C) f32

    # --- precomputed block-diagonal causal additive bias over folded rows ----
    attn_bias = bias_ref[...]                                             # (M, M) f32

    # --- consolidated small vectors (LN weights/biases, linear biases) -------
    smalls = smalls_ref[...]                                              # (8L+2, 128) f32

    for l in range(N_LAYER):                 # static unroll; weights stay in VMEM
        base = 8 * l
        ln1_w = smalls[base + 0:base + 1, :C]
        ln1_b = smalls[base + 1:base + 2, :C]
        b_qkv = smalls[base + 2:base + 3, :3 * C]     # q-part already pre-scaled
        b_prj = smalls[base + 3:base + 4, :C]
        ln2_w = smalls[base + 4:base + 5, :C]
        ln2_b = smalls[base + 5:base + 6, :C]
        b_fc = smalls[base + 6:base + 7, :4 * C]
        b_pr2 = smalls[base + 7:base + 8, :C]

        # ---------------- attention branch ----------------
        xn = _layernorm(x, ln1_w, ln1_b)
        # single fused QKV matmul: (M, C) x (C, 3C); 1/sqrt(D) folded into Q cols
        qkv = jnp.dot(xn.astype(jnp.bfloat16), wqkv_ref[l],
                      preferred_element_type=jnp.float32) + b_qkv          # (M, 3C) f32

        head_outs = []
        for h in range(H):                   # static per-head lane slices
            qh = qkv[:, 0 * C + h * D:0 * C + (h + 1) * D].astype(jnp.bfloat16)
            kh = qkv[:, 1 * C + h * D:1 * C + (h + 1) * D].astype(jnp.bfloat16)
            vh = qkv[:, 2 * C + h * D:2 * C + (h + 1) * D].astype(jnp.bfloat16)

            att = lax.dot_general(qh, kh, (((1,), (1,)), ((), ())),
                                  preferred_element_type=jnp.float32)     # (M, M)
            att = att + attn_bias
            att = att - jnp.max(att, axis=-1, keepdims=True)
            p = jnp.exp(att)
            # approx reciprocal (EUP). For exact PyTorch softmax parity use
            # an exact divide (approx=False) instead.
            p = p * pl.reciprocal(jnp.sum(p, axis=-1, keepdims=True), approx=True)
            head_outs.append(jnp.dot(p.astype(jnp.bfloat16), vh,
                                     preferred_element_type=jnp.float32))  # (M, D)

        y = jnp.concatenate(head_outs, axis=-1)                            # (M, C)
        # single output projection; residual (dropout p=0 -> identity)
        x = x + jnp.dot(y.astype(jnp.bfloat16), wproj_ref[l],
                        preferred_element_type=jnp.float32) + b_prj

        # ---------------- MLP branch ----------------
        xn2 = _layernorm(x, ln2_w, ln2_b)
        h1 = jnp.dot(xn2.astype(jnp.bfloat16), wfc_ref[l],
                     preferred_element_type=jnp.float32) + b_fc            # (M, 4C)
        h1 = _gelu_exact(h1)
        x = x + jnp.dot(h1.astype(jnp.bfloat16), wpr2_ref[l],
                        preferred_element_type=jnp.float32) + b_pr2

    # --- final LN + weight-tied lm_head (128-lane slab -> unmasked stores) ---
    lnf_w = smalls[8 * N_LAYER + 0:8 * N_LAYER + 1, :C]
    lnf_b = smalls[8 * N_LAYER + 1:8 * N_LAYER + 2, :C]
    xf = _layernorm(x, lnf_w, lnf_b)
    o_ref[...] = jnp.dot(xf.astype(jnp.bfloat16), wlm_ref[...],
                         preferred_element_type=jnp.float32)


# ----------------------------- parameter init --------------------------------
def init_params(key):
    std = 0.02
    proj_std = 0.02 / math.sqrt(2 * N_LAYER)   # c_proj.weight special init
    keys = jax.random.split(key, 2 + 4 * N_LAYER)
    ki = iter(range(len(keys)))

    params = {}
    params["wte"] = std * jax.random.normal(keys[next(ki)], (VOCAB, N_EMBD), jnp.float32)
    params["wpe"] = std * jax.random.normal(keys[next(ki)], (BLOCK_SIZE, N_EMBD), jnp.float32)

    blocks = []
    for _ in range(N_LAYER):
        blk = dict(
            ln1_w=jnp.ones((N_EMBD,), jnp.float32),
            ln1_b=jnp.zeros((N_EMBD,), jnp.float32),
            w_qkv=std * jax.random.normal(keys[next(ki)], (N_EMBD, 3 * N_EMBD), jnp.float32),
            b_qkv=jnp.zeros((3 * N_EMBD,), jnp.float32),
            w_proj=proj_std * jax.random.normal(keys[next(ki)], (N_EMBD, N_EMBD), jnp.float32),
            b_proj=jnp.zeros((N_EMBD,), jnp.float32),
            ln2_w=jnp.ones((N_EMBD,), jnp.float32),
            ln2_b=jnp.zeros((N_EMBD,), jnp.float32),
            w_fc=std * jax.random.normal(keys[next(ki)], (N_EMBD, 4 * N_EMBD), jnp.float32),
            b_fc=jnp.zeros((4 * N_EMBD,), jnp.float32),
            w_pr2=proj_std * jax.random.normal(keys[next(ki)], (4 * N_EMBD, N_EMBD), jnp.float32),
            b_pr2=jnp.zeros((N_EMBD,), jnp.float32),
        )
        blocks.append(blk)
    params["blocks"] = blocks

    params["lnf_w"] = jnp.ones((N_EMBD,), jnp.float32)
    params["lnf_b"] = jnp.zeros((N_EMBD,), jnp.float32)
    return params


def pack_params(params):
    """Called ONCE at init.  Converts torch-layout weights into the kernel's
    consolidated layout: one bf16 slab per weight class, one (8L+2, 128) f32
    slab for every LN weight/bias and linear bias, and a 128-lane padded
    weight-tied lm_head.  The 1/sqrt(head_dim) attention scale is folded into
    the Q columns of w_qkv / b_qkv."""
    C = N_EMBD
    scale = 1.0 / math.sqrt(HEAD_DIM)

    def pad_row(v):
        return jnp.zeros((SMALL_W,), jnp.float32).at[:v.shape[0]].set(
            v.astype(jnp.float32))

    w_qkv_l, w_proj_l, w_fc_l, w_pr2_l, small_rows = [], [], [], [], []
    for blk in params["blocks"]:
        w_qkv = blk["w_qkv"].at[:, :C].multiply(scale)       # fold attn scale (Q)
        b_qkv = blk["b_qkv"].at[:C].multiply(scale)
        w_qkv_l.append(w_qkv.astype(jnp.bfloat16))
        w_proj_l.append(blk["w_proj"].astype(jnp.bfloat16))
        w_fc_l.append(blk["w_fc"].astype(jnp.bfloat16))
        w_pr2_l.append(blk["w_pr2"].astype(jnp.bfloat16))
        small_rows += [pad_row(blk["ln1_w"]), pad_row(blk["ln1_b"]),
                       pad_row(b_qkv), pad_row(blk["b_proj"]),
                       pad_row(blk["ln2_w"]), pad_row(blk["ln2_b"]),
                       pad_row(blk["b_fc"]), pad_row(blk["b_pr2"])]
    small_rows += [pad_row(params["lnf_w"]), pad_row(params["lnf_b"])]

    # tie_weights: lm_head.weight = wte.weight -> W_lm = wte.T, padded to 128 lanes
    w_lm = (jnp.zeros((C, V_PAD), jnp.float32)
            .at[:, :VOCAB].set(params["wte"].T).astype(jnp.bfloat16))

    return dict(
        wte=params["wte"].astype(jnp.bfloat16),
        wpe=params["wpe"],
        smalls=jnp.stack(small_rows),              # (8L+2, 128) f32
        w_qkv=jnp.stack(w_qkv_l),                  # (L, C, 3C) bf16
        w_proj=jnp.stack(w_proj_l),                # (L, C, C)  bf16
        w_fc=jnp.stack(w_fc_l),                    # (L, C, 4C) bf16
        w_pr2=jnp.stack(w_pr2_l),                  # (L, 4C, C) bf16
        w_lm=w_lm,                                 # (C, 128)   bf16
    )


# ----------------------------- full forward ----------------------------------
@jax.jit
def transformer_forward(idx, packed):
    """Everything per-call (one_hot, pos tile, causal bias, kernel, slice)
    lives under this single jit -> one dispatch per generation step."""
    B, T = idx.shape
    assert T <= BLOCK_SIZE
    M = B * T

    onehot = jax.nn.one_hot(idx.reshape(M), VOCAB, dtype=jnp.bfloat16)   # (M, V)
    pos = jnp.tile(packed["wpe"][:T], (B, 1))                            # (M, C) f32

    # block-diagonal causal additive bias over the folded (B*T) rows
    r = jnp.arange(M, dtype=jnp.int32)
    keep = ((r[:, None] // T) == (r[None, :] // T)) & \
           ((r[:, None] % T) >= (r[None, :] % T))
    attn_bias = jnp.where(keep, 0.0, NEG_INF).astype(jnp.float32)        # (M, M)

    vmem = pl.BlockSpec(memory_space=pltpu.MemorySpace.VMEM)

    logits_pad = pl.pallas_call(
        fused_forward_kernel,
        out_shape=jax.ShapeDtypeStruct((M, V_PAD), jnp.float32),
        in_specs=[vmem] * 10,
        out_specs=vmem,
    )(onehot, packed["wte"], pos, attn_bias, packed["smalls"],
      packed["w_qkv"], packed["w_proj"], packed["w_fc"], packed["w_pr2"],
      packed["w_lm"])

    return logits_pad[:, :VOCAB].reshape(B, T, VOCAB)


# ----------------------------- main ------------------------------------------
if __name__ == "__main__":
    key = jax.random.PRNGKey(0)
    k_params, k_idx = jax.random.split(key)
    params = init_params(k_params)
    packed = pack_params(params)          # hoisted: once at init, not per call

    B, T = 2, 8
    idx = jax.random.randint(k_idx, (B, T), 0, VOCAB, dtype=jnp.int32)

    logits = transformer_forward(idx, packed)
    jax.block_until_ready(logits)
    assert logits.shape == (B, T, VOCAB)
    assert bool(jnp.all(jnp.isfinite(logits)))
    print("KERNEL_OK")
</pallas_src>

<mosaic_0001>
module attributes {stable_mosaic.version = 11 : i64} {
  func.func @fused_forward_kernel(%arg0: memref<16x64xbf16, #tpu.memory_space<vmem>>, %arg1: memref<64x32xbf16, #tpu.memory_space<vmem>>, %arg2: memref<16x32xf32, #tpu.memory_space<vmem>>, %arg3: memref<16x16xf32, #tpu.memory_space<vmem>>, %arg4: memref<18x128xf32, #tpu.memory_space<vmem>>, %arg5: memref<2x32x96xbf16, #tpu.memory_space<vmem>>, %arg6: memref<2x32x32xbf16, #tpu.memory_space<vmem>>, %arg7: memref<2x32x128xbf16, #tpu.memory_space<vmem>>, %arg8: memref<2x128x32xbf16, #tpu.memory_space<vmem>>, %arg9: memref<32x128xbf16, #tpu.memory_space<vmem>>, %arg10: memref<16x128xf32, #tpu.memory_space<vmem>>) attributes {dimension_semantics = [], scalar_prefetch = 0 : i64, scratch_operands = 0 : i64, tpu.core_type = #tpu.core_type<tc>} {
    %c0 = arith.constant 0 : index
    %c0_0 = arith.constant 0 : index
    %0 = vector.load %arg0[%c0, %c0_0] : memref<16x64xbf16, #tpu.memory_space<vmem>>, vector<16x64xbf16>
    %c0_1 = arith.constant 0 : index
    %c0_2 = arith.constant 0 : index
    %1 = vector.load %arg1[%c0_1, %c0_2] : memref<64x32xbf16, #tpu.memory_space<vmem>>, vector<64x32xbf16>
    %cst = arith.constant dense<0.000000e+00> : vector<16x32xf32>
    %2 = tpu.matmul %0, %1, %cst {dimension_numbers = #tpu.dot_dimension_numbers<[1], [0], [0], [1], [0, 0, 1, 1], [], []>} : vector<16x64xbf16>, vector<64x32xbf16>, vector<16x32xf32> -> vector<16x32xf32>
    %c0_3 = arith.constant 0 : index
    %c0_4 = arith.constant 0 : index
    %3 = vector.load %arg2[%c0_3, %c0_4] : memref<16x32xf32, #tpu.memory_space<vmem>>, vector<16x32xf32>
    %4 = arith.addf %2, %3 : vector<16x32xf32>
    %c0_5 = arith.constant 0 : index
    %c0_6 = arith.constant 0 : index
    %5 = vector.load %arg3[%c0_5, %c0_6] : memref<16x16xf32, #tpu.memory_space<vmem>>, vector<16x16xf32>
    %c0_7 = arith.constant 0 : index
    %c0_8 = arith.constant 0 : index
    %6 = vector.load %arg4[%c0_7, %c0_8] : memref<18x128xf32, #tpu.memory_space<vmem>>, vector<18x128xf32>
    %7 = vector.extract_strided_slice %6 {offsets = [0, 0], sizes = [1, 32], strides = [1, 1]} : vector<18x128xf32> to vector<1x32xf32>
    %8 = vector.extract_strided_slice %6 {offsets = [1, 0], sizes = [1, 32], strides = [1, 1]} : vector<18x128xf32> to vector<1x32xf32>
    %9 = vector.extract_strided_slice %6 {offsets = [2, 0], sizes = [1, 96], strides = [1, 1]} : vector<18x128xf32> to vector<1x96xf32>
    %10 = vector.extract_strided_slice %6 {offsets = [3, 0], sizes = [1, 32], strides = [1, 1]} : vector<18x128xf32> to vector<1x32xf32>
    %11 = vector.extract_strided_slice %6 {offsets = [4, 0], sizes = [1, 32], strides = [1, 1]} : vector<18x128xf32> to vector<1x32xf32>
    %12 = vector.extract_strided_slice %6 {offsets = [5, 0], sizes = [1, 32], strides = [1, 1]} : vector<18x128xf32> to vector<1x32xf32>
    %13 = vector.extract_strided_slice %6 {offsets = [6, 0], sizes = [1, 128], strides = [1, 1]} : vector<18x128xf32> to vector<1x128xf32>
    %14 = vector.extract_strided_slice %6 {offsets = [7, 0], sizes = [1, 32], strides = [1, 1]} : vector<18x128xf32> to vector<1x32xf32>
    %cst_9 = arith.constant dense<0.000000e+00> : vector<16xf32>
    %15 = vector.multi_reduction <add>, %4, %cst_9 [1] : vector<16x32xf32> to vector<16xf32>
    %16 = vector.shape_cast %15 : vector<16xf32> to vector<16x1xf32>
    %cst_10 = arith.constant 3.200000e+01 : f32
    %17 = vector.broadcast %cst_10 : f32 to vector<16x1xf32>
    %18 = arith.divf %16, %17 : vector<16x1xf32>
    %19 = vector.broadcast %18 : vector<16x1xf32> to vector<16x32xf32>
    %20 = arith.subf %4, %19 : vector<16x32xf32>
    %21 = arith.mulf %20, %20 : vector<16x32xf32>
    %cst_11 = arith.constant dense<0.000000e+00> : vector<16xf32>
    %22 = vector.multi_reduction <add>, %21, %cst_11 [1] : vector<16x32xf32> to vector<16xf32>
    %23 = vector.shape_cast %22 : vector<16xf32> to vector<16x1xf32>
    %cst_12 = arith.constant 3.200000e+01 : f32
    %24 = vector.broadcast %cst_12 : f32 to vector<16x1xf32>
    %25 = arith.divf %23, %24 : vector<16x1xf32>
    %26 = vector.broadcast %18 : vector<16x1xf32> to vector<16x32xf32>
    %27 = arith.subf %4, %26 : vector<16x32xf32>
    %cst_13 = arith.constant 9.99999974E-6 : f32
    %28 = vector.broadcast %cst_13 : f32 to vector<16x1xf32>
    %29 = arith.addf %25, %28 : vector<16x1xf32>
    %30 = math.rsqrt %29 : vector<16x1xf32>
    %31 = vector.broadcast %30 : vector<16x1xf32> to vector<16x32xf32>
    %32 = arith.mulf %27, %31 : vector<16x32xf32>
    %33 = vector.broadcast %7 : vector<1x32xf32> to vector<16x32xf32>
    %34 = arith.mulf %32, %33 : vector<16x32xf32>
    %35 = vector.broadcast %8 : vector<1x32xf32> to vector<16x32xf32>
    %36 = arith.addf %34, %35 : vector<16x32xf32>
    %37 = arith.truncf %36 : vector<16x32xf32> to vector<16x32xbf16>
    %c0_14 = arith.constant 0 : index
    %c0_15 = arith.constant 0 : index
    %c0_16 = arith.constant 0 : index
    %38 = vector.load %arg5[%c0_14, %c0_15, %c0_16] : memref<2x32x96xbf16, #tpu.memory_space<vmem>>, vector<1x32x96xbf16>
    %39 = vector.shape_cast %38 : vector<1x32x96xbf16> to vector<32x96xbf16>
    %cst_17 = arith.constant dense<0.000000e+00> : vector<16x96xf32>
    %40 = tpu.matmul %37, %39, %cst_17 {dimension_numbers = #tpu.dot_dimension_numbers<[1], [0], [0], [1], [0, 0, 1, 1], [], []>} : vector<16x32xbf16>, vector<32x96xbf16>, vector<16x96xf32> -> vector<16x96xf32>
    %41 = vector.broadcast %9 : vector<1x96xf32> to vector<16x96xf32>
    %42 = arith.addf %40, %41 : vector<16x96xf32>
    %43 = vector.extract_strided_slice %42 {offsets = [0, 0], sizes = [16, 16], strides = [1, 1]} : vector<16x96xf32> to vector<16x16xf32>
    %44 = arith.truncf %43 : vector<16x16xf32> to vector<16x16xbf16>
    %45 = vector.extract_strided_slice %42 {offsets = [0, 32], sizes = [16, 16], strides = [1, 1]} : vector<16x96xf32> to vector<16x16xf32>
    %46 = arith.truncf %45 : vector<16x16xf32> to vector<16x16xbf16>
    %47 = vector.extract_strided_slice %42 {offsets = [0, 64], sizes = [16, 16], strides = [1, 1]} : vector<16x96xf32> to vector<16x16xf32>
    %48 = arith.truncf %47 : vector<16x16xf32> to vector<16x16xbf16>
    %cst_18 = arith.constant dense<0.000000e+00> : vector<16x16xf32>
    %49 = tpu.matmul %44, %46, %cst_18 {dimension_numbers = #tpu.dot_dimension_numbers<[1], [1], [0], [0], [0, 0, 1, 0], [], []>} : vector<16x16xbf16>, vector<16x16xbf16>, vector<16x16xf32> -> vector<16x16xf32>
    %50 = arith.addf %49, %5 : vector<16x16xf32>
    %cst_19 = arith.constant dense<0xFF800000> : vector<16xf32>
    %51 = vector.multi_reduction <maximumf>, %50, %cst_19 [1] : vector<16x16xf32> to vector<16xf32>
    %52 = vector.shape_cast %51 : vector<16xf32> to vector<16x1xf32>
    %53 = vector.broadcast %52 : vector<16x1xf32> to vector<16x16xf32>
    %54 = arith.subf %50, %53 : vector<16x16xf32>
    %55 = math.exp %54 : vector<16x16xf32>
    %cst_20 = arith.constant dense<0.000000e+00> : vector<16xf32>
    %56 = vector.multi_reduction <add>, %55, %cst_20 [1] : vector<16x16xf32> to vector<16xf32>
    %57 = vector.shape_cast %56 : vector<16xf32> to vector<16x1xf32>
    %58 = tpu.reciprocal %57 {approx = true} : vector<16x1xf32> -> vector<16x1xf32>
    %59 = vector.broadcast %58 : vector<16x1xf32> to vector<16x16xf32>
    %60 = arith.mulf %55, %59 : vector<16x16xf32>
    %61 = arith.truncf %60 : vector<16x16xf32> to vector<16x16xbf16>
    %cst_21 = arith.constant dense<0.000000e+00> : vector<16x16xf32>
    %62 = tpu.matmul %61, %48, %cst_21 {dimension_numbers = #tpu.dot_dimension_numbers<[1], [0], [0], [1], [0, 0, 1, 1], [], []>} : vector<16x16xbf16>, vector<16x16xbf16>, vector<16x16xf32> -> vector<16x16xf32>
    %63 = vector.extract_strided_slice %42 {offsets = [0, 16], sizes = [16, 16], strides = [1, 1]} : vector<16x96xf32> to vector<16x16xf32>
    %64 = arith.truncf %63 : vector<16x16xf32> to vector<16x16xbf16>
    %65 = vector.extract_strided_slice %42 {offsets = [0, 48], sizes = [16, 16], strides = [1, 1]} : vector<16x96xf32> to vector<16x16xf32>
    %66 = arith.truncf %65 : vector<16x16xf32> to vector<16x16xbf16>
    %67 = vector.extract_strided_slice %42 {offsets = [0, 80], sizes = [16, 16], strides = [1, 1]} : vector<16x96xf32> to vector<16x16xf32>
    %68 = arith.truncf %67 : vector<16x16xf32> to vector<16x16xbf16>
    %cst_22 = arith.constant dense<0.000000e+00> : vector<16x16xf32>
    %69 = tpu.matmul %64, %66, %cst_22 {dimension_numbers = #tpu.dot_dimension_numbers<[1], [1], [0], [0], [0, 0, 1, 0], [], []>} : vector<16x16xbf16>, vector<16x16xbf16>, vector<16x16xf32> -> vector<16x16xf32>
    %70 = arith.addf %69, %5 : vector<16x16xf32>
    %cst_23 = arith.constant dense<0xFF800000> : vector<16xf32>
    %71 = vector.multi_reduction <maximumf>, %70, %cst_23 [1] : vector<16x16xf32> to vector<16xf32>
    %72 = vector.shape_cast %71 : vector<16xf32> to vector<16x1xf32>
    %73 = vector.broadcast %72 : vector<16x1xf32> to vector<16x16xf32>
    %74 = arith.subf %70, %73 : vector<16x16xf32>
    %75 = math.exp %74 : vector<16x16xf32>
    %cst_24 = arith.constant dense<0.000000e+00> : vector<16xf32>
    %76 = vector.multi_reduction <add>, %75, %cst_24 [1] : vector<16x16xf32> to vector<16xf32>
    %77 = vector.shape_cast %76 : vector<16xf32> to vector<16x1xf32>
    %78 = tpu.reciprocal %77 {approx = true} : vector<16x1xf32> -> vector<16x1xf32>
    %79 = vector.broadcast %78 : vector<16x1xf32> to vector<16x16xf32>
    %80 = arith.mulf %75, %79 : vector<16x16xf32>
    %81 = arith.truncf %80 : vector<16x16xf32> to vector<16x16xbf16>
    %cst_25 = arith.constant dense<0.000000e+00> : vector<16x16xf32>
    %82 = tpu.matmul %81, %68, %cst_25 {dimension_numbers = #tpu.dot_dimension_numbers<[1], [0], [0], [1], [0, 0, 1, 1], [], []>} : vector<16x16xbf16>, vector<16x16xbf16>, vector<16x16xf32> -> vector<16x16xf32>
    %83 = tpu.concatenate %62, %82 in 1 : vector<16x16xf32>, vector<16x16xf32> -> vector<16x32xf32>
    %84 = arith.truncf %83 : vector<16x32xf32> to vector<16x32xbf16>
    %c0_26 = arith.constant 0 : index
    %c0_27 = arith.constant 0 : index
    %c0_28 = arith.constant 0 : index
    %85 = vector.load %arg6[%c0_26, %c0_27, %c0_28] : memref<2x32x32xbf16, #tpu.memory_space<vmem>>, vector<1x32x32xbf16>
    %86 = vector.shape_cast %85 : vector<1x32x32xbf16> to vector<32x32xbf16>
    %cst_29 = arith.constant dense<0.000000e+00> : vector<16x32xf32>
    %87 = tpu.matmul %84, %86, %cst_29 {dimension_numbers = #tpu.dot_dimension_numbers<[1], [0], [0], [1], [0, 0, 1, 1], [], []>} : vector<16x32xbf16>, vector<32x32xbf16>, vector<16x32xf32> -> vector<16x32xf32>
    %88 = arith.addf %4, %87 : vector<16x32xf32>
    %89 = vector.broadcast %10 : vector<1x32xf32> to vector<16x32xf32>
    %90 = arith.addf %88, %89 : vector<16x32xf32>
    %cst_30 = arith.constant dense<0.000000e+00> : vector<16xf32>
    %91 = vector.multi_reduction <add>, %90, %cst_30 [1] : vector<16x32xf32> to vector<16xf32>
    %92 = vector.shape_cast %91 : vector<16xf32> to vector<16x1xf32>
    %cst_31 = arith.constant 3.200000e+01 : f32
    %93 = vector.broadcast %cst_31 : f32 to vector<16x1xf32>
    %94 = arith.divf %92, %93 : vector<16x1xf32>
    %95 = vector.broadcast %94 : vector<16x1xf32> to vector<16x32xf32>
    %96 = arith.subf %90, %95 : vector<16x32xf32>
    %97 = arith.mulf %96, %96 : vector<16x32xf32>
    %cst_32 = arith.constant dense<0.000000e+00> : vector<16xf32>
    %98 = vector.multi_reduction <add>, %97, %cst_32 [1] : vector<16x32xf32> to vector<16xf32>
    %99 = vector.shape_cast %98 : vector<16xf32> to vector<16x1xf32>
    %cst_33 = arith.constant 3.200000e+01 : f32
    %100 = vector.broadcast %cst_33 : f32 to vector<16x1xf32>
    %101 = arith.divf %99, %100 : vector<16x1xf32>
    %102 = vector.broadcast %94 : vector<16x1xf32> to vector<16x32xf32>
    %103 = arith.subf %90, %102 : vector<16x32xf32>
    %cst_34 = arith.constant 9.99999974E-6 : f32
    %104 = vector.broadcast %cst_34 : f32 to vector<16x1xf32>
    %105 = arith.addf %101, %104 : vector<16x1xf32>
    %106 = math.rsqrt %105 : vector<16x1xf32>
    %107 = vector.broadcast %106 : vector<16x1xf32> to vector<16x32xf32>
    %108 = arith.mulf %103, %107 : vector<16x32xf32>
    %109 = vector.broadcast %11 : vector<1x32xf32> to vector<16x32xf32>
    %110 = arith.mulf %108, %109 : vector<16x32xf32>
    %111 = vector.broadcast %12 : vector<1x32xf32> to vector<16x32xf32>
    %112 = arith.addf %110, %111 : vector<16x32xf32>
    %113 = arith.truncf %112 : vector<16x32xf32> to vector<16x32xbf16>
    %c0_35 = arith.constant 0 : index
    %c0_36 = arith.constant 0 : index
    %c0_37 = arith.constant 0 : index
    %114 = vector.load %arg7[%c0_35, %c0_36, %c0_37] : memref<2x32x128xbf16, #tpu.memory_space<vmem>>, vector<1x32x128xbf16>
    %115 = vector.shape_cast %114 : vector<1x32x128xbf16> to vector<32x128xbf16>
    %cst_38 = arith.constant dense<0.000000e+00> : vector<16x128xf32>
    %116 = tpu.matmul %113, %115, %cst_38 {dimension_numbers = #tpu.dot_dimension_numbers<[1], [0], [0], [1], [0, 0, 1, 1], [], []>} : vector<16x32xbf16>, vector<32x128xbf16>, vector<16x128xf32> -> vector<16x128xf32>
    %117 = vector.broadcast %13 : vector<1x128xf32> to vector<16x128xf32>
    %118 = arith.addf %116, %117 : vector<16x128xf32>
    %cst_39 = arith.constant 5.000000e-01 : f32
    %119 = vector.broadcast %cst_39 : f32 to vector<16x128xf32>
    %120 = arith.mulf %119, %118 : vector<16x128xf32>
    %cst_40 = arith.constant 1.41421354 : f32
    %121 = vector.broadcast %cst_40 : f32 to vector<16x128xf32>
    %122 = arith.divf %118, %121 : vector<16x128xf32>
    %123 = math.erf %122 : vector<16x128xf32>
    %cst_41 = arith.constant 1.000000e+00 : f32
    %124 = vector.broadcast %cst_41 : f32 to vector<16x128xf32>
    %125 = arith.addf %124, %123 : vector<16x128xf32>
    %126 = arith.mulf %120, %125 : vector<16x128xf32>
    %127 = arith.truncf %126 : vector<16x128xf32> to vector<16x128xbf16>
    %c0_42 = arith.constant 0 : index
    %c0_43 = arith.constant 0 : index
    %c0_44 = arith.constant 0 : index
    %128 = vector.load %arg8[%c0_42, %c0_43, %c0_44] : memref<2x128x32xbf16, #tpu.memory_space<vmem>>, vector<1x128x32xbf16>
    %129 = vector.shape_cast %128 : vector<1x128x32xbf16> to vector<128x32xbf16>
    %cst_45 = arith.constant dense<0.000000e+00> : vector<16x32xf32>
    %130 = tpu.matmul %127, %129, %cst_45 {dimension_numbers = #tpu.dot_dimension_numbers<[1], [0], [0], [1], [0, 0, 1, 1], [], []>} : vector<16x128xbf16>, vector<128x32xbf16>, vector<16x32xf32> -> vector<16x32xf32>
    %131 = arith.addf %90, %130 : vector<16x32xf32>
    %132 = vector.broadcast %14 : vector<1x32xf32> to vector<16x32xf32>
    %133 = arith.addf %131, %132 : vector<16x32xf32>
    %134 = vector.extract_strided_slice %6 {offsets = [8, 0], sizes = [1, 32], strides = [1, 1]} : vector<18x128xf32> to vector<1x32xf32>
    %135 = vector.extract_strided_slice %6 {offsets = [9, 0], sizes = [1, 32], strides = [1, 1]} : vector<18x128xf32> to vector<1x32xf32>
    %136 = vector.extract_strided_slice %6 {offsets = [10, 0], sizes = [1, 96], strides = [1, 1]} : vector<18x128xf32> to vector<1x96xf32>
    %137 = vector.extract_strided_slice %6 {offsets = [11, 0], sizes = [1, 32], strides = [1, 1]} : vector<18x128xf32> to vector<1x32xf32>
    %138 = vector.extract_strided_slice %6 {offsets = [12, 0], sizes = [1, 32], strides = [1, 1]} : vector<18x128xf32> to vector<1x32xf32>
    %139 = vector.extract_strided_slice %6 {offsets = [13, 0], sizes = [1, 32], strides = [1, 1]} : vector<18x128xf32> to vector<1x32xf32>
    %140 = vector.extract_strided_slice %6 {offsets = [14, 0], sizes = [1, 128], strides = [1, 1]} : vector<18x128xf32> to vector<1x128xf32>
    %141 = vector.extract_strided_slice %6 {offsets = [15, 0], sizes = [1, 32], strides = [1, 1]} : vector<18x128xf32> to vector<1x32xf32>
    %cst_46 = arith.constant dense<0.000000e+00> : vector<16xf32>
    %142 = vector.multi_reduction <add>, %133, %cst_46 [1] : vector<16x32xf32> to vector<16xf32>
    %143 = vector.shape_cast %142 : vector<16xf32> to vector<16x1xf32>
    %cst_47 = arith.constant 3.200000e+01 : f32
    %144 = vector.broadcast %cst_47 : f32 to vector<16x1xf32>
    %145 = arith.divf %143, %144 : vector<16x1xf32>
    %146 = vector.broadcast %145 : vector<16x1xf32> to vector<16x32xf32>
    %147 = arith.subf %133, %146 : vector<16x32xf32>
    %148 = arith.mulf %147, %147 : vector<16x32xf32>
    %cst_48 = arith.constant dense<0.000000e+00> : vector<16xf32>
    %149 = vector.multi_reduction <add>, %148, %cst_48 [1] : vector<16x32xf32> to vector<16xf32>
    %150 = vector.shape_cast %149 : vector<16xf32> to vector<16x1xf32>
    %cst_49 = arith.constant 3.200000e+01 : f32
    %151 = vector.broadcast %cst_49 : f32 to vector<16x1xf32>
    %152 = arith.divf %150, %151 : vector<16x1xf32>
    %153 = vector.broadcast %145 : vector<16x1xf32> to vector<16x32xf32>
    %154 = arith.subf %133, %153 : vector<16x32xf32>
    %cst_50 = arith.constant 9.99999974E-6 : f32
    %155 = vector.broadcast %cst_50 : f32 to vector<16x1xf32>
    %156 = arith.addf %152, %155 : vector<16x1xf32>
    %157 = math.rsqrt %156 : vector<16x1xf32>
    %158 = vector.broadcast %157 : vector<16x1xf32> to vector<16x32xf32>
    %159 = arith.mulf %154, %158 : vector<16x32xf32>
    %160 = vector.broadcast %134 : vector<1x32xf32> to vector<16x32xf32>
    %161 = arith.mulf %159, %160 : vector<16x32xf32>
    %162 = vector.broadcast %135 : vector<1x32xf32> to vector<16x32xf32>
    %163 = arith.addf %161, %162 : vector<16x32xf32>
    %164 = arith.truncf %163 : vector<16x32xf32> to vector<16x32xbf16>
    %c1 = arith.constant 1 : index
    %c0_51 = arith.constant 0 : index
    %c0_52 = arith.constant 0 : index
    %165 = vector.load %arg5[%c1, %c0_51, %c0_52] : memref<2x32x96xbf16, #tpu.memory_space<vmem>>, vector<1x32x96xbf16>
    %166 = vector.shape_cast %165 : vector<1x32x96xbf16> to vector<32x96xbf16>
    %cst_53 = arith.constant dense<0.000000e+00> : vector<16x96xf32>
    %167 = tpu.matmul %164, %166, %cst_53 {dimension_numbers = #tpu.dot_dimension_numbers<[1], [0], [0], [1], [0, 0, 1, 1], [], []>} : vector<16x32xbf16>, vector<32x96xbf16>, vector<16x96xf32> -> vector<16x96xf32>
    %168 = vector.broadcast %136 : vector<1x96xf32> to vector<16x96xf32>
    %169 = arith.addf %167, %168 : vector<16x96xf32>
    %170 = vector.extract_strided_slice %169 {offsets = [0, 0], sizes = [16, 16], strides = [1, 1]} : vector<16x96xf32> to vector<16x16xf32>
    %171 = arith.truncf %170 : vector<16x16xf32> to vector<16x16xbf16>
    %172 = vector.extract_strided_slice %169 {offsets = [0, 32], sizes = [16, 16], strides = [1, 1]} : vector<16x96xf32> to vector<16x16xf32>
    %173 = arith.truncf %172 : vector<16x16xf32> to vector<16x16xbf16>
    %174 = vector.extract_strided_slice %169 {offsets = [0, 64], sizes = [16, 16], strides = [1, 1]} : vector<16x96xf32> to vector<16x16xf32>
    %175 = arith.truncf %174 : vector<16x16xf32> to vector<16x16xbf16>
    %cst_54 = arith.constant dense<0.000000e+00> : vector<16x16xf32>
    %176 = tpu.matmul %171, %173, %cst_54 {dimension_numbers = #tpu.dot_dimension_numbers<[1], [1], [0], [0], [0, 0, 1, 0], [], []>} : vector<16x16xbf16>, vector<16x16xbf16>, vector<16x16xf32> -> vector<16x16xf32>
    %177 = arith.addf %176, %5 : vector<16x16xf32>
    %cst_55 = arith.constant dense<0xFF800000> : vector<16xf32>
    %178 = vector.multi_reduction <maximumf>, %177, %cst_55 [1] : vector<16x16xf32> to vector<16xf32>
    %179 = vector.shape_cast %178 : vector<16xf32> to vector<16x1xf32>
    %180 = vector.broadcast %179 : vector<16x1xf32> to vector<16x16xf32>
    %181 = arith.subf %177, %180 : vector<16x16xf32>
    %182 = math.exp %181 : vector<16x16xf32>
    %cst_56 = arith.constant dense<0.000000e+00> : vector<16xf32>
    %183 = vector.multi_reduction <add>, %182, %cst_56 [1] : vector<16x16xf32> to vector<16xf32>
    %184 = vector.shape_cast %183 : vector<16xf32> to vector<16x1xf32>
    %185 = tpu.reciprocal %184 {approx = true} : vector<16x1xf32> -> vector<16x1xf32>
    %186 = vector.broadcast %185 : vector<16x1xf32> to vector<16x16xf32>
    %187 = arith.mulf %182, %186 : vector<16x16xf32>
    %188 = arith.truncf %187 : vector<16x16xf32> to vector<16x16xbf16>
    %cst_57 = arith.constant dense<0.000000e+00> : vector<16x16xf32>
    %189 = tpu.matmul %188, %175, %cst_57 {dimension_numbers = #tpu.dot_dimension_numbers<[1], [0], [0], [1], [0, 0, 1, 1], [], []>} : vector<16x16xbf16>, vector<16x16xbf16>, vector<16x16xf32> -> vector<16x16xf32>
    %190 = vector.extract_strided_slice %169 {offsets = [0, 16], sizes = [16, 16], strides = [1, 1]} : vector<16x96xf32> to vector<16x16xf32>
    %191 = arith.truncf %190 : vector<16x16xf32> to vector<16x16xbf16>
    %192 = vector.extract_strided_slice %169 {offsets = [0, 48], sizes = [16, 16], strides = [1, 1]} : vector<16x96xf32> to vector<16x16xf32>
    %193 = arith.truncf %192 : vector<16x16xf32> to vector<16x16xbf16>
    %194 = vector.extract_strided_slice %169 {offsets = [0, 80], sizes = [16, 16], strides = [1, 1]} : vector<16x96xf32> to vector<16x16xf32>
    %195 = arith.truncf %194 : vector<16x16xf32> to vector<16x16xbf16>
    %cst_58 = arith.constant dense<0.000000e+00> : vector<16x16xf32>
    %196 = tpu.matmul %191, %193, %cst_58 {dimension_numbers = #tpu.dot_dimension_numbers<[1], [1], [0], [0], [0, 0, 1, 0], [], []>} : vector<16x16xbf16>, vector<16x16xbf16>, vector<16x16xf32> -> vector<16x16xf32>
    %197 = arith.addf %196, %5 : vector<16x16xf32>
    %cst_59 = arith.constant dense<0xFF800000> : vector<16xf32>
    %198 = vector.multi_reduction <maximumf>, %197, %cst_59 [1] : vector<16x16xf32> to vector<16xf32>
    %199 = vector.shape_cast %198 : vector<16xf32> to vector<16x1xf32>
    %200 = vector.broadcast %199 : vector<16x1xf32> to vector<16x16xf32>
    %201 = arith.subf %197, %200 : vector<16x16xf32>
    %202 = math.exp %201 : vector<16x16xf32>
    %cst_60 = arith.constant dense<0.000000e+00> : vector<16xf32>
    %203 = vector.multi_reduction <add>, %202, %cst_60 [1] : vector<16x16xf32> to vector<16xf32>
    %204 = vector.shape_cast %203 : vector<16xf32> to vector<16x1xf32>
    %205 = tpu.reciprocal %204 {approx = true} : vector<16x1xf32> -> vector<16x1xf32>
    %206 = vector.broadcast %205 : vector<16x1xf32> to vector<16x16xf32>
    %207 = arith.mulf %202, %206 : vector<16x16xf32>
    %208 = arith.truncf %207 : vector<16x16xf32> to vector<16x16xbf16>
    %cst_61 = arith.constant dense<0.000000e+00> : vector<16x16xf32>
    %209 = tpu.matmul %208, %195, %cst_61 {dimension_numbers = #tpu.dot_dimension_numbers<[1], [0], [0], [1], [0, 0, 1, 1], [], []>} : vector<16x16xbf16>, vector<16x16xbf16>, vector<16x16xf32> -> vector<16x16xf32>
    %210 = tpu.concatenate %189, %209 in 1 : vector<16x16xf32>, vector<16x16xf32> -> vector<16x32xf32>
    %211 = arith.truncf %210 : vector<16x32xf32> to vector<16x32xbf16>
    %c1_62 = arith.constant 1 : index
    %c0_63 = arith.constant 0 : index
    %c0_64 = arith.constant 0 : index
    %212 = vector.load %arg6[%c1_62, %c0_63, %c0_64] : memref<2x32x32xbf16, #tpu.memory_space<vmem>>, vector<1x32x32xbf16>
    %213 = vector.shape_cast %212 : vector<1x32x32xbf16> to vector<32x32xbf16>
    %cst_65 = arith.constant dense<0.000000e+00> : vector<16x32xf32>
    %214 = tpu.matmul %211, %213, %cst_65 {dimension_numbers = #tpu.dot_dimension_numbers<[1], [0], [0], [1], [0, 0, 1, 1], [], []>} : vector<16x32xbf16>, vector<32x32xbf16>, vector<16x32xf32> -> vector<16x32xf32>
    %215 = arith.addf %133, %214 : vector<16x32xf32>
    %216 = vector.broadcast %137 : vector<1x32xf32> to vector<16x32xf32>
    %217 = arith.addf %215, %216 : vector<16x32xf32>
    %cst_66 = arith.constant dense<0.000000e+00> : vector<16xf32>
    %218 = vector.multi_reduction <add>, %217, %cst_66 [1] : vector<16x32xf32> to vector<16xf32>
    %219 = vector.shape_cast %218 : vector<16xf32> to vector<16x1xf32>
    %cst_67 = arith.constant 3.200000e+01 : f32
    %220 = vector.broadcast %cst_67 : f32 to vector<16x1xf32>
    %221 = arith.divf %219, %220 : vector<16x1xf32>
    %222 = vector.broadcast %221 : vector<16x1xf32> to vector<16x32xf32>
    %223 = arith.subf %217, %222 : vector<16x32xf32>
    %224 = arith.mulf %223, %223 : vector<16x32xf32>
    %cst_68 = arith.constant dense<0.000000e+00> : vector<16xf32>
    %225 = vector.multi_reduction <add>, %224, %cst_68 [1] : vector<16x32xf32> to vector<16xf32>
    %226 = vector.shape_cast %225 : vector<16xf32> to vector<16x1xf32>
    %cst_69 = arith.constant 3.200000e+01 : f32
    %227 = vector.broadcast %cst_69 : f32 to vector<16x1xf32>
    %228 = arith.divf %226, %227 : vector<16x1xf32>
    %229 = vector.broadcast %221 : vector<16x1xf32> to vector<16x32xf32>
    %230 = arith.subf %217, %229 : vector<16x32xf32>
    %cst_70 = arith.constant 9.99999974E-6 : f32
    %231 = vector.broadcast %cst_70 : f32 to vector<16x1xf32>
    %232 = arith.addf %228, %231 : vector<16x1xf32>
    %233 = math.rsqrt %232 : vector<16x1xf32>
    %234 = vector.broadcast %233 : vector<16x1xf32> to vector<16x32xf32>
    %235 = arith.mulf %230, %234 : vector<16x32xf32>
    %236 = vector.broadcast %138 : vector<1x32xf32> to vector<16x32xf32>
    %237 = arith.mulf %235, %236 : vector<16x32xf32>
    %238 = vector.broadcast %139 : vector<1x32xf32> to vector<16x32xf32>
    %239 = arith.addf %237, %238 : vector<16x32xf32>
    %240 = arith.truncf %239 : vector<16x32xf32> to vector<16x32xbf16>
    %c1_71 = arith.constant 1 : index
    %c0_72 = arith.constant 0 : index
    %c0_73 = arith.constant 0 : index
    %241 = vector.load %arg7[%c1_71, %c0_72, %c0_73] : memref<2x32x128xbf16, #tpu.memory_space<vmem>>, vector<1x32x128xbf16>
    %242 = vector.shape_cast %241 : vector<1x32x128xbf16> to vector<32x128xbf16>
    %cst_74 = arith.constant dense<0.000000e+00> : vector<16x128xf32>
    %243 = tpu.matmul %240, %242, %cst_74 {dimension_numbers = #tpu.dot_dimension_numbers<[1], [0], [0], [1], [0, 0, 1, 1], [], []>} : vector<16x32xbf16>, vector<32x128xbf16>, vector<16x128xf32> -> vector<16x128xf32>
    %244 = vector.broadcast %140 : vector<1x128xf32> to vector<16x128xf32>
    %245 = arith.addf %243, %244 : vector<16x128xf32>
    %cst_75 = arith.constant 5.000000e-01 : f32
    %246 = vector.broadcast %cst_75 : f32 to vector<16x128xf32>
    %247 = arith.mulf %246, %245 : vector<16x128xf32>
    %cst_76 = arith.constant 1.41421354 : f32
    %248 = vector.broadcast %cst_76 : f32 to vector<16x128xf32>
    %249 = arith.divf %245, %248 : vector<16x128xf32>
    %250 = math.erf %249 : vector<16x128xf32>
    %cst_77 = arith.constant 1.000000e+00 : f32
    %251 = vector.broadcast %cst_77 : f32 to vector<16x128xf32>
    %252 = arith.addf %251, %250 : vector<16x128xf32>
    %253 = arith.mulf %247, %252 : vector<16x128xf32>
    %254 = arith.truncf %253 : vector<16x128xf32> to vector<16x128xbf16>
    %c1_78 = arith.constant 1 : index
    %c0_79 = arith.constant 0 : index
    %c0_80 = arith.constant 0 : index
    %255 = vector.load %arg8[%c1_78, %c0_79, %c0_80] : memref<2x128x32xbf16, #tpu.memory_space<vmem>>, vector<1x128x32xbf16>
    %256 = vector.shape_cast %255 : vector<1x128x32xbf16> to vector<128x32xbf16>
    %cst_81 = arith.constant dense<0.000000e+00> : vector<16x32xf32>
    %257 = tpu.matmul %254, %256, %cst_81 {dimension_numbers = #tpu.dot_dimension_numbers<[1], [0], [0], [1], [0, 0, 1, 1], [], []>} : vector<16x128xbf16>, vector<128x32xbf16>, vector<16x32xf32> -> vector<16x32xf32>
    %258 = arith.addf %217, %257 : vector<16x32xf32>
    %259 = vector.broadcast %141 : vector<1x32xf32> to vector<16x32xf32>
    %260 = arith.addf %258, %259 : vector<16x32xf32>
    %261 = vector.extract_strided_slice %6 {offsets = [16, 0], sizes = [1, 32], strides = [1, 1]} : vector<18x128xf32> to vector<1x32xf32>
    %262 = vector.extract_strided_slice %6 {offsets = [17, 0], sizes = [1, 32], strides = [1, 1]} : vector<18x128xf32> to vector<1x32xf32>
    %cst_82 = arith.constant dense<0.000000e+00> : vector<16xf32>
    %263 = vector.multi_reduction <add>, %260, %cst_82 [1] : vector<16x32xf32> to vector<16xf32>
    %264 = vector.shape_cast %263 : vector<16xf32> to vector<16x1xf32>
    %cst_83 = arith.constant 3.200000e+01 : f32
    %265 = vector.broadcast %cst_83 : f32 to vector<16x1xf32>
    %266 = arith.divf %264, %265 : vector<16x1xf32>
    %267 = vector.broadcast %266 : vector<16x1xf32> to vector<16x32xf32>
    %268 = arith.subf %260, %267 : vector<16x32xf32>
    %269 = arith.mulf %268, %268 : vector<16x32xf32>
    %cst_84 = arith.constant dense<0.000000e+00> : vector<16xf32>
    %270 = vector.multi_reduction <add>, %269, %cst_84 [1] : vector<16x32xf32> to vector<16xf32>
    %271 = vector.shape_cast %270 : vector<16xf32> to vector<16x1xf32>
    %cst_85 = arith.constant 3.200000e+01 : f32
    %272 = vector.broadcast %cst_85 : f32 to vector<16x1xf32>
    %273 = arith.divf %271, %272 : vector<16x1xf32>
    %274 = vector.broadcast %266 : vector<16x1xf32> to vector<16x32xf32>
    %275 = arith.subf %260, %274 : vector<16x32xf32>
    %cst_86 = arith.constant 9.99999974E-6 : f32
    %276 = vector.broadcast %cst_86 : f32 to vector<16x1xf32>
    %277 = arith.addf %273, %276 : vector<16x1xf32>
    %278 = math.rsqrt %277 : vector<16x1xf32>
    %279 = vector.broadcast %278 : vector<16x1xf32> to vector<16x32xf32>
    %280 = arith.mulf %275, %279 : vector<16x32xf32>
    %281 = vector.broadcast %261 : vector<1x32xf32> to vector<16x32xf32>
    %282 = arith.mulf %280, %281 : vector<16x32xf32>
    %283 = vector.broadcast %262 : vector<1x32xf32> to vector<16x32xf32>
    %284 = arith.addf %282, %283 : vector<16x32xf32>
    %285 = arith.truncf %284 : vector<16x32xf32> to vector<16x32xbf16>
    %c0_87 = arith.constant 0 : index
    %c0_88 = arith.constant 0 : index
    %286 = vector.load %arg9[%c0_87, %c0_88] : memref<32x128xbf16, #tpu.memory_space<vmem>>, vector<32x128xbf16>
    %cst_89 = arith.constant dense<0.000000e+00> : vector<16x128xf32>
    %287 = tpu.matmul %285, %286, %cst_89 {dimension_numbers = #tpu.dot_dimension_numbers<[1], [0], [0], [1], [0, 0, 1, 1], [], []>} : vector<16x32xbf16>, vector<32x128xbf16>, vector<16x128xf32> -> vector<16x128xf32>
    %c0_90 = arith.constant 0 : index
    %c0_91 = arith.constant 0 : index
    %288 = vector.load %arg10[%c0_90, %c0_91] : memref<16x128xf32, #tpu.memory_space<vmem>>, vector<16x128xf32>
    tpu.vector_store %arg10[%c0_90, %c0_91], %287 {strides = array<i32>} : memref<16x128xf32, #tpu.memory_space<vmem>>, vector<16x128xf32>,
    return
  }
}

</mosaic_0001>

<bundles_post_ra>
// kernel: eq.1
= control target key start
LH: loop header
LB: loop body
LE: loop exit
PB: predicated region body
PF: predicated region fallthrough
CT: control target
= control target key end

     0   :  { %2 = vsyncpa [#allocation1], 0  ;;  %s58_s6 = smov [#allocation0]   ;;  %s85_s0 = inlined_call_operand.hbm [shape: s32[2,8], index: 0, kind: input, shape index: {}]   ;;  %s86_s1 = inlined_call_operand.vmem [shape: s32[16], index: 1, kind: output, shape index: {}]  }
   0x1   :  { %s7_s7 = sshll.u32 %s58_s6, 4  ;;  %s34_s10 = scalar_lea.hbm %s85_s0, 32  ;;  %s8_s7 = int_to_ptr.vmem [resolvable:$true] %s7_s7 }
   0x2   :  { %p35_p0 = scmp.ne.s32.totalorder %s85_s0, %s34_s10  ;;  %p38_p1 = scmp.lt.u32.totalorder %s34_s10, %s85_s0 }
   0x4   :  { %p40_p2 = pnand %p38_p1, %p35_p0 }
   0x6   :  { %43 = shalt.err (!%p40_p2)
}
   0x7   :  { %s44_s15 = scalar_lea.vmem %s8_s7, 32  ;;  %p49_p4 = scmp.lt.s32.totalorder %s8_s7, %s8_s7 }
   0x8   :  { %p45_p3 = scmp.ne.s32.totalorder %s8_s7, %s44_s15  ;;  %p50_p5 = scmp.lt.s32.totalorder %s44_s15, %s44_s15 }
   0xa   :  { %p51_p6 = por %p50_p5, %p49_p4 }
   0xc   :  { %p52_p7 = pnand %p51_p6, %p45_p3 }
   0xe   :  { %55 = shalt.err (!%p52_p7)
}
   0xf   :  { %10 = dma.hbm_to_vmem [thread:$0]  %s85_s0, 32, %s8_s7, [#allocation1]  }
  0x10   :  { %56 = dma.done.wait [#allocation1], 32  }
  0x11   :  { %57 = vsyncadd [#allocation1], 4294967264  ;;  %v14_v0 = vld [vmem:[#allocation0] sm:$0x3]  ;;  %vm17_vm0 = vcmask 64512   ;;  %s59_s0 = smov 8  }
  0x12   :  { %15 = vst [vmem:[#allocation3] sm:$0x3] %v14_v0  ;;  %vm23_vm1 = vcmask 130112  }
  0x19   :  { %v16_v1 = vld [vmem:[#allocation3] sm:$0x1]   ;;  %v20_v2 = vld [vmem:[#allocation3 + $0x1] sm:$0x1]  }
  0x1a   :  { %21 = vrot.lane.b32.xlu0 %v20_v2, %s59_s0  ;;  %18 = vst.msk [vmem:[#allocation2] sm:$0x1] %vm17_vm0, %v16_v1  }
  0x8c   :  { %v22_v3 = vpop.permute.xlu0 %21  }
  0x8d   :  { %24 = vst.msk [vmem:[#allocation2] sm:$0x1] %vm23_vm1, %v22_v3  }
  0x94   :  { %v28_v4 = vld [vmem:[#allocation2] sm:$0x1] }
  0x95   :  { %30 = vst [vmem:[%s86_s1] sm:$0x1] %v28_v4 }
  0x96   :  { %31 = vsyncpa [#allocation1], 1 }

// kernel: transformer_forward.1
= control target key start
LH: loop header
LB: loop body
LE: loop exit
PB: predicated region body
PF: predicated region fallthrough
CT: control target
= control target key end

     0   :  { %v1950_v0 = vmov 0.0   ;;  %vm1951_vm0 = vmmov 0   ;;  %vm77_vm1 = vcmask 523264   ;;  %vm127_vm2 = vcmask 261120   ;;  %s1952_s30 = smov 96   ;;  %s1953_s11 = smov 80   ;;  %s2429_s1 = inlined_call_operand.vmem [shape: bf16[64,32], index: 1, kind: input, shape index: {}]   ;;  %s2430_s0 = inlined_call_operand.vmem [shape: bf16[16,64], index: 0, kind: input, shape index: {}]   ;;  %s2431_s2 = inlined_call_operand.vmem [shape: f32[16,32], index: 2, kind: input, shape index: {}]   ;;  %s2432_s5 = inlined_call_operand.vmem [shape: bf16[2,32,96], index: 5, kind: input, shape index: {}]   ;;  %s2433_s4 = inlined_call_operand.vmem [shape: f32[18,128], index: 4, kind: input, shape index: {}]   ;;  %s2434_s3 = inlined_call_operand.vmem [shape: f32[16,16], index: 3, kind: input, shape index: {}]   ;;  %s2435_s6 = inlined_call_operand.vmem [shape: bf16[2,32,32], index: 6, kind: input, shape index: {}]   ;;  %s2436_s7 = inlined_call_operand.vmem [shape: bf16[2,32,128], index: 7, kind: input, shape index: {}]   ;;  %s2437_s8 = inlined_call_operand.vmem [shape: bf16[2,128,32], index: 8, kind: input, shape index: {}]   ;;  %s2438_s9 = inlined_call_operand.vmem [shape: bf16[32,128], index: 9, kind: input, shape index: {}]   ;;  %s2439_s10 = inlined_call_operand.vmem [shape: f32[16,128], index: 10, kind: output, shape index: {}]  }
   0x1   :  { %1681 = vmatprep.subr.bf16.mxu1 %v1950_v0  ;;  %v1855_v1 = vld [vmem:[%s2429_s1] sm:$0xff]   ;;  %1689 = vmatprep.mubr.msk.bf16.mxu1 %vm1951_vm0, %v1950_v0  ;;  %v1856_v2 = vld [vmem:[%s2429_s1 + $0x8] sm:$0xff]   ;;  %v1857_v3 = vld [vmem:[%s2429_s1 + $0x10] sm:$0xff]   ;;  %v155_v31 = vlaneseq  ;;  %s1954_s12 = smov 112   ;;  %vm236_vm3 = vcmask 130048   ;;  %s1956_s17 = smov 48  }
   0x2   :  { %1707 = vmatprep.subr.bf16.mxu0 %v1950_v0  ;;  %1709 = vmatprep.mubr.msk.bf16.mxu0 %vm1951_vm0, %v1950_v0  ;;  %v1858_v4 = vld [vmem:[%s2429_s1 + $0x18] sm:$0xff]   ;;  %v1859_v5 = vld [vmem:[%s2430_s0] sm:$0xff]   ;;  %v47_v8 = vld [vmem:[%s2431_s2 + $0x8] sm:$0xff]  ;;  %s1957_s22 = smov 16  }
   0x3   :  { %1682 = vmatpush3.bf16.msra.mxu1 %v1855_v1  ;;  %v46_v6 = vld [vmem:[%s2431_s2] sm:$0xff]  ;;  %v1861_v27 = vld [vmem:[%s2432_s5 + $0x8] sm:$0xff]   ;;  %v2066_v35 = vshrl.u32 %v155_v31, 7 }
   0x4   :  { %1683 = vmatprep.subr.bf16.mxu1 %v1950_v0  ;;  %v1860_v26 = vld [vmem:[%s2432_s5] sm:$0xff]   ;;  %v2112_v63 = vld [vmem:[%s2434_s3 + $0x8] sm:$0xff] }
   0x5   :  { %v2069_v36 = vsub.s32 0, %v2066_v35  ;;  %v2074_v37 = vld [vmem:[%s2433_s4] sm:$0xff]  ;;  %v2079_v41 = vsub.s32 1, %v2066_v35  ;;  %v174_v50 = vsub.s32 2, %v2066_v35 }
   0x6   :  { %v2107_v61 = vld [vmem:[%s2434_s3] sm:$0xff]  ;;  %s1955_s3 = smov 64  }
   0x7   :  { %1684 = vmatpush3.bf16.msra.mxu1 %v1856_v2  ;;  %v158_v39 = vrot.slane %v2074_v37, %v2069_v36  ;;  %v164_v45 = vrot.slane %v2074_v37, %v2079_v41  ;;  %v175_v51 = vrot.slane %v2074_v37, %v174_v50 }
   0x8   :  { %1685 = vmatprep.subr.bf16.mxu1 %v1950_v0 }
   0xb   :  { %1686 = vmatpush3.bf16.msra.mxu1 %v1857_v3 }
   0xc   :  { %1687 = vmatprep.subr.bf16.mxu1 %v1950_v0 }
   0xf   :  { %1688 = vmatpush3.bf16.msra.mxu1 %v1858_v4 }
  0x10   :  { %1693 = vmatprep.subr.bf16.mxu1 %v1950_v0 }
  0x12   :  { %1690 = vmatmul.mubr.msk.bf16.vlgmr.msra.gmra.mrb[0].mxu1 %vm77_vm1, %v1859_v5 }
  0x13   :  { %1697 = vmatprep.mubr.msk.bf16.mxu1 %vm1951_vm0, %v1950_v0  ;;  %1694 = vmatpush3.bf16.msra.mxu1 %v1860_v26 }
  0x14   :  { %1695 = vmatprep.subr.bf16.mxu1 %v1950_v0 }
  0x17   :  { %1696 = vmatpush3.bf16.msra.mxu1 %v1861_v27 }
  0x18   :  { %1701 = vmatprep.subr.bf16.mxu1 %v1950_v0 }
  0xe5   :  { %v115_v7 = vpop.f32.mrb[0].mxu1 }
  0xe6   :  { %v2046_v9 = vadd.f32 %v115_v7, %v46_v6  ;;  %v1691_v10 = vpop.f32.mrb[1].mxu1 }
  0xe7   :  { %v118_v11 = vpop.f32.mrb[2].mxu1 }
  0xe8   :  { %v2048_v12 = vadd.f32 %v118_v11, %v47_v8  ;;  %v1692_v13 = vpop.f32.mrb[3].mxu1  ;;  %v128_v14 = vsel %vm127_vm2, %v2046_v9, 0.0 }
  0xe9   :  { %129 = vadd.xlane.f32.xlu0 %v128_v14 }
  0xea   :  { %v131_v15 = vsel %vm127_vm2, %v2048_v12, 0.0 }
  0xed   :  { %132 = vadd.xlane.f32.xlu0 %v131_v15 }
 0x176   :  { %v130_v16 = vpop.xlane.xlu0 %129 }
 0x177   :  { %v135_v17 = vmul.f32 0.03125, %v130_v16 }
 0x179   :  { %v137_v18 = vsub.f32 %v2046_v9, %v135_v17 }
 0x17a   :  { %v133_v19 = vpop.xlane.xlu0 %132 }
 0x17b   :  { %v136_v20 = vmul.f32 0.03125, %v133_v19  ;;  %v139_v21 = vmul.f32 %v137_v18, %v137_v18 }
 0x17d   :  { %v138_v22 = vsub.f32 %v2048_v12, %v136_v20  ;;  %v141_v23 = vsel %vm127_vm2, %v139_v21, 0.0 }
 0x17e   :  { %142 = vadd.xlane.f32.xlu1 %v141_v23 }
 0x17f   :  { %v140_v24 = vmul.f32 %v138_v22, %v138_v22 }
 0x181   :  { %v144_v25 = vsel %vm127_vm2, %v140_v24, 0.0 }
 0x182   :  { %145 = vadd.xlane.f32.xlu1 %v144_v25 }
 0x20b   :  { %v143_v28 = vpop.xlane.xlu1 %142 }
 0x20c   :  { %v147_v29 = vmul.f32 0.03125, %v143_v28 }
 0x20e   :  { %v149_v30 = vadd.f32 1e-05, %v147_v29 }
 0x20f   :  { %v146_v32 = vpop.xlane.xlu1 %145 }
 0x210   :  { %1890 = vrsqrt.f32 %v149_v30  ;;  %v148_v33 = vmul.f32 0.03125, %v146_v32 }
 0x212   :  { %v150_v34 = vadd.f32 1e-05, %v148_v33 }
 0x214   :  { %1892 = vrsqrt.f32 %v150_v34 }
 0x21a   :  { %v1891_v38 = vpop.eup %1890 }
 0x21b   :  { %v153_v40 = vmul.f32 %v1891_v38, %v137_v18 }
 0x21d   :  { %v159_v43 = vmul.f32 %v158_v39, %v153_v40 }
 0x21e   :  { %v1893_v42 = vpop.eup %1892 }
 0x21f   :  { %v154_v44 = vmul.f32 %v1893_v42, %v138_v22  ;;  %v165_v47 = vadd.f32 %v164_v45, %v159_v43 }
 0x221   :  { %v160_v46 = vmul.f32 %v158_v39, %v154_v44 }
 0x223   :  { %v166_v48 = vadd.f32 %v164_v45, %v160_v46 }
 0x225   :  { %v167_v49 = vpack.c.bf16 %v166_v48, %v165_v47 }
 0x227   :  { %1698 = vmatmul.mubr.msk.bf16.vlgmr.msra.gmra.mrb[4].mxu1 %vm127_vm2, %v167_v49 }
 0x228   :  { %1703 = vmatprep.mubr.msk.bf16.mxu1 %vm1951_vm0, %v1950_v0 }
 0x2fa   :  { %v225_v52 = vpop.f32.mrb[4].mxu1 }
 0x2fb   :  { %v1699_v53 = vpop.f32.mrb[5].mxu1  ;;  %v226_v55 = vadd.f32 %v225_v52, %v175_v51 }
 0x2fc   :  { %v228_v54 = vpop.f32.mrb[6].mxu1 }
 0x2fd   :  { %v229_v56 = vadd.f32 %v228_v54, %v175_v51  ;;  %v1700_v57 = vpop.f32.mrb[7].mxu1 }
 0x2ff   :  { %v2090_v58 = vpack.c.bf16 %v229_v56, %v226_v55 }
 0x301   :  { %234 = vrot.lane.b32.xlu0 %v2090_v58, %s1952_s30 }
 0x305   :  { %356 = vrot.lane.b32.xlu0 %v2090_v58, %s1953_s11 }
 0x309   :  { %354 = vrot.lane.b32.xlu0 %v2090_v58, %s1954_s12 }
 0x373   :  { %v235_v59 = vpop.permute.xlu0 %234 }
 0x374   :  { %v241_v60 = vsel %vm236_vm3, %v235_v59, 0 }
 0x375   :  { %1702 = vmatpush3.bf16.xpose.msra.mxu1 %v241_v60 }
 0x376   :  { %1725 = vmatprep.subr.bf16.mxu1 %v1950_v0 }
 0x377   :  { %v357_v27 = vpop.permute.xlu0 %356 }
 0x378   :  { %v362_v29 = vsel %vm236_vm3, %v357_v27, 0 }
 0x37b   :  { %v355_v30 = vpop.permute.xlu0 %354 }
 0x37c   :  { %1704 = vmatmul.mubr.msk.bf16.vlgmr.msra.gmra.mrb[8].mxu1 %vm236_vm3, %v2090_v58 }
 0x37d   :  { %1729 = vmatprep.mubr.msk.bf16.mxu1 %vm1951_vm0, %v1950_v0 }
 0x44f   :  { %v277_v62 = vpop.f32.mrb[8].mxu1 }
 0x450   :  { %v278_v1 = vadd.f32 %v277_v62, %v2107_v61  ;;  %v1705_v2 = vpop.f32.mrb[9].mxu1 }
 0x451   :  { %v280_v3 = vpop.f32.mrb[10].mxu1 }
 0x452   :  { %v281_v4 = vadd.f32 %v280_v3, %v2112_v63  ;;  %v1706_v5 = vpop.f32.mrb[11].mxu1  ;;  %v284_v6 = vsel %vm236_vm3, %v278_v1, -inf }
 0x453   :  { %285 = vmax.xlane.f32.xlu1 %v284_v6  ;;  %v1863_v6 = vld [vmem:[%s2435_s6 + $0x8] sm:$0xff]  }
 0x454   :  { %v287_v7 = vsel %vm236_vm3, %v281_v4, -inf }
 0x457   :  { %288 = vmax.xlane.f32.xlu1 %v287_v7 }
 0x4e0   :  { %v286_v8 = vpop.xlane.xlu1 %285 }
 0x4e1   :  { %v290_v10 = vsub.f32 %v278_v1, %v286_v8 }
 0x4e3   :  { %v292_v11 = vmul.f32 1.442695, %v290_v10 }
 0x4e4   :  { %v289_v13 = vpop.xlane.xlu1 %288 }
 0x4e5   :  { %1894 = vpow2.f32 %v292_v11  ;;  %v291_v14 = vsub.f32 %v281_v4, %v289_v13 }
 0x4e7   :  { %v294_v15 = vmul.f32 1.442695, %v291_v14 }
 0x4e9   :  { %1896 = vpow2.f32 %v294_v15 }
 0x4ef   :  { %v1895_v16 = vpop.eup %1894 }
 0x4f0   :  { %v296_v17 = vsel %vm236_vm3, %v1895_v16, 0.0 }
 0x4f1   :  { %297 = vadd.xlane.f32.xlu1 %v296_v17 }
 0x4f3   :  { %v1897_v18 = vpop.eup %1896 }
 0x4f4   :  { %v299_v19 = vsel %vm236_vm3, %v1897_v18, 0.0 }
 0x4f5   :  { %300 = vadd.xlane.f32.xlu1 %v299_v19 }
 0x506   :  { %307 = vrot.lane.b32.xlu1 %v2090_v58, %s1955_s3 }
 0x57e   :  { %v298_v20 = vpop.xlane.xlu1 %297 }
 0x57f   :  { %1898 = vrcp.f32 %v298_v20  ;;  %v550_v20 = vsub.s32 3, %v2066_v35 }
 0x582   :  { %v301_v21 = vpop.xlane.xlu1 %300 }
 0x583   :  { %1900 = vrcp.f32 %v301_v21  ;;  %v551_v21 = vrot.slane %v2074_v37, %v550_v20 }
 0x586   :  { %v308_v22 = vpop.permute.xlu1 %307 }
 0x587   :  { %1708 = vmatpush3.bf16.msra.mxu0 %v308_v22 }
 0x588   :  { %1713 = vmatprep.subr.bf16.mxu0 %v1950_v0 }
 0x589   :  { %v1899_v23 = vpop.eup %1898 }
 0x58a   :  { %v304_v25 = vmul.f32 %v1899_v23, %v1895_v16 }
 0x58d   :  { %v1901_v24 = vpop.eup %1900 }
 0x58e   :  { %v305_v26 = vmul.f32 %v1901_v24, %v1897_v18 }
 0x590   :  { %v306_v28 = vpack.c.bf16 %v305_v26, %v304_v25 }
 0x592   :  { %1710 = vmatmul.mubr.msk.bf16.vlgmr.msra.gmra.mrb[0].mxu0 %vm236_vm3, %v306_v28 }
 0x593   :  { %1714 = vmatpush3.bf16.xpose.msra.mxu0 %v362_v29  ;;  %1715 = vmatprep.mubr.msk.bf16.mxu0 %vm1951_vm0, %v1950_v0 }
 0x594   :  { %1719 = vmatprep.subr.bf16.mxu0 %v1950_v0 }
 0x59a   :  { %1716 = vmatmul.mubr.msk.bf16.vlgmr.msra.gmra.mrb[4].mxu0 %vm236_vm3, %v355_v30 }
 0x59b   :  { %1721 = vmatprep.mubr.msk.bf16.mxu0 %vm1951_vm0, %v1950_v0 }
 0x665   :  { %v2131_v31 = vpop.f32.mrb[0].mxu0 }
 0x666   :  { %v1711_v32 = vpop.f32.mrb[1].mxu0 }
 0x667   :  { %v350_v33 = vpop.f32.mrb[2].mxu0 }
 0x668   :  { %v1712_v34 = vpop.f32.mrb[3].mxu0 }
 0x66d   :  { %v398_v38 = vpop.f32.mrb[4].mxu0 }
 0x66e   :  { %v399_v39 = vadd.f32 %v398_v38, %v2107_v61  ;;  %v1717_v40 = vpop.f32.mrb[5].mxu0 }
 0x66f   :  { %v401_v42 = vpop.f32.mrb[6].mxu0 }
 0x670   :  { %v402_v43 = vadd.f32 %v401_v42, %v2112_v63  ;;  %v1718_v44 = vpop.f32.mrb[7].mxu0  ;;  %v405_v45 = vsel %vm236_vm3, %v399_v39, -inf }
 0x671   :  { %406 = vmax.xlane.f32.xlu0 %v405_v45  ;;  %v1864_v44 = vld [vmem:[%s2436_s7] sm:$0xff]   ;;  %v1865_v45 = vld [vmem:[%s2436_s7 + $0x8] sm:$0xff]  }
 0x672   :  { %v408_v46 = vsel %vm236_vm3, %v402_v43, -inf }
 0x673   :  { %409 = vmax.xlane.f32.xlu1 %v408_v46  ;;  %v1866_v46 = vld [vmem:[%s2437_s8] sm:$0xff]  }
 0x6fe   :  { %v407_v47 = vpop.xlane.xlu0 %406 }
 0x6ff   :  { %v411_v48 = vsub.f32 %v399_v39, %v407_v47  ;;  %v1867_v47 = vld [vmem:[%s2437_s8 + $0x8] sm:$0xff]  }
 0x700   :  { %v410_v49 = vpop.xlane.xlu1 %409 }
 0x701   :  { %v413_v51 = vmul.f32 1.442695, %v411_v48  ;;  %v412_v52 = vsub.f32 %v402_v43, %v410_v49 }
 0x703   :  { %1902 = vpow2.f32 %v413_v51  ;;  %v415_v53 = vmul.f32 1.442695, %v412_v52 }
 0x705   :  { %1904 = vpow2.f32 %v415_v53 }
 0x70d   :  { %v1903_v54 = vpop.eup %1902 }
 0x70e   :  { %v417_v55 = vsel %vm236_vm3, %v1903_v54, 0.0 }
 0x70f   :  { %v1905_v56 = vpop.eup %1904  ;;  %418 = vadd.xlane.f32.xlu0 %v417_v55  ;;  %v582_v55 = vsub.s32 4, %v2066_v35 }
 0x710   :  { %v420_v57 = vsel %vm236_vm3, %v1905_v56, 0.0 }
 0x713   :  { %421 = vadd.xlane.f32.xlu0 %v420_v57  ;;  %v588_v57 = vsub.s32 5, %v2066_v35 }
 0x729   :  { %428 = vrot.lane.b32.xlu0 %v2090_v58, %s1956_s17  ;;  %v1862_v58 = vld [vmem:[%s2435_s6] sm:$0xff]  }
 0x72a   :  { %1726 = vmatpush3.bf16.msra.mxu1 %v1862_v58 }
 0x72b   :  { %1727 = vmatprep.subr.bf16.mxu1 %v1950_v0 }
 0x72e   :  { %1728 = vmatpush3.bf16.msra.mxu1 %v1863_v6 }
 0x72f   :  { %1741 = vmatprep.subr.bf16.mxu1 %v1950_v0 }
 0x79c   :  { %v419_v59 = vpop.xlane.xlu0 %418 }
 0x79d   :  { %1906 = vrcp.f32 %v419_v59 }
 0x7a0   :  { %v422_v60 = vpop.xlane.xlu0 %421 }
 0x7a1   :  { %1908 = vrcp.f32 %v422_v60 }
 0x7a4   :  { %v429_v62 = vpop.permute.xlu0 %428 }
 0x7a5   :  { %1720 = vmatpush3.bf16.msra.mxu0 %v429_v62 }
 0x7a6   :  { %1733 = vmatprep.subr.bf16.mxu0 %v1950_v0 }
 0x7a7   :  { %v1907_v1 = vpop.eup %1906 }
 0x7a8   :  { %v425_v3 = vmul.f32 %v1907_v1, %v1903_v54 }
 0x7ab   :  { %v1909_v2 = vpop.eup %1908 }
 0x7ac   :  { %v426_v4 = vmul.f32 %v1909_v2, %v1905_v56  ;;  %v583_v56 = vrot.slane %v2074_v37, %v582_v55 }
 0x7ae   :  { %v427_v5 = vpack.c.bf16 %v426_v4, %v425_v3  ;;  %v589_v3 = vrot.slane %v2074_v37, %v588_v57 }
 0x7b0   :  { %1722 = vmatmul.mubr.msk.bf16.vlgmr.msra.gmra.mrb[8].mxu0 %vm236_vm3, %v427_v5 }
 0x7b1   :  { %1737 = vmatprep.mubr.msk.bf16.mxu0 %vm1951_vm0, %v1950_v0  ;;  %1734 = vmatpush3.bf16.msra.mxu0 %v1864_v44 }
 0x7b2   :  { %1735 = vmatprep.subr.bf16.mxu0 %v1950_v0 }
 0x7b5   :  { %1736 = vmatpush3.bf16.msra.mxu0 %v1865_v45 }
 0x7b6   :  { %1761 = vmatprep.subr.bf16.mxu0 %v1950_v0 }
 0x883   :  { %v468_v7 = vpop.f32.mrb[8].mxu0 }
 0x884   :  { %v1723_v8 = vpop.f32.mrb[9].mxu0 }
 0x885   :  { %v471_v10 = vpop.f32.mrb[10].mxu0  ;;  %v1869_v8 = vld [vmem:[%s2437_s8 + $0x18] sm:$0xff]  }
 0x886   :  { %v1845_v11 = vpack.i.bf16 %v471_v10, %v468_v7  ;;  %v1724_v13 = vpop.f32.mrb[11].mxu0  ;;  %v1868_v7 = vld [vmem:[%s2437_s8 + $0x10] sm:$0xff]   ;;  %v1870_v10 = vld [vmem:[%s2437_s8 + $0x20] sm:$0xff]  }
 0x887   :  { %v1872_v13 = vld [vmem:[%s2437_s8 + $0x30] sm:$0xff]  }
 0x888   :  { %1846 = vrot.lane.b32.xlu1 %v1845_v11, %s1957_s22  ;;  %v1871_v11 = vld [vmem:[%s2437_s8 + $0x28] sm:$0xff]  }
 0x8fa   :  { %v1847_v14 = vpop.permute.xlu1 %1846 }
 0x8fb   :  { %v1849_v15 = vunpack.i.h.bf16 %v1847_v14  ;;  %v1848_v16 = vunpack.i.l.bf16 %v1847_v14  ;;  %v1873_v14 = vld [vmem:[%s2437_s8 + $0x38] sm:$0xff]  }
 0x8fd   :  { %v484_v17 = vsel %vm236_vm3, %v350_v33, %v1849_v15  ;;  %v483_v18 = vsel %vm236_vm3, %v2131_v31, %v1848_v16  ;;  %v599_v15 = vsub.s32 6, %v2066_v35 }
 0x8fe   :  { %v485_v19 = vpack.c.bf16 %v484_v17, %v483_v18 }
 0x8ff   :  { %v600_v16 = vrot.slane %v2074_v37, %v599_v15 }
 0x900   :  { %1730 = vmatmul.mubr.msk.bf16.vlgmr.msra.gmra.mrb[12].mxu1 %vm127_vm2, %v485_v19 }
 0x901   :  { %1757 = vmatprep.mubr.msk.bf16.mxu1 %vm1951_vm0, %v1950_v0  ;;  %1742 = vmatpush3.bf16.msra.mxu1 %v1866_v46 }
 0x902   :  { %1743 = vmatprep.subr.bf16.mxu1 %v1950_v0 }
 0x905   :  { %1744 = vmatpush3.bf16.msra.mxu1 %v1867_v47 }
 0x906   :  { %1745 = vmatprep.subr.bf16.mxu1 %v1950_v0 }
 0x909   :  { %1746 = vmatpush3.bf16.msra.mxu1 %v1868_v7 }
 0x90a   :  { %1747 = vmatprep.subr.bf16.mxu1 %v1950_v0 }
 0x90d   :  { %1748 = vmatpush3.bf16.msra.mxu1 %v1869_v8  ;;  %v2264_v8 = vld [vmem:[%s2433_s4 + $0x8] sm:$0xff] }
 0x90e   :  { %1749 = vmatprep.subr.bf16.mxu1 %v1950_v0 }
 0x911   :  { %1750 = vmatpush3.bf16.msra.mxu1 %v1870_v10  ;;  %v811_v10 = vrot.slane %v2264_v8, %v2069_v36 }
 0x912   :  { %1751 = vmatprep.subr.bf16.mxu1 %v1950_v0 }
 0x915   :  { %1752 = vmatpush3.bf16.msra.mxu1 %v1871_v11 }
 0x916   :  { %1753 = vmatprep.subr.bf16.mxu1 %v1950_v0 }
 0x919   :  { %1754 = vmatpush3.bf16.msra.mxu1 %v1872_v13 }
 0x91a   :  { %1755 = vmatprep.subr.bf16.mxu1 %v1950_v0 }
 0x91d   :  { %1756 = vmatpush3.bf16.msra.mxu1 %v1873_v14 }
 0x91e   :  { %1787 = vmatprep.subr.bf16.mxu1 %v1950_v0 }
 0x9d3   :  { %v539_v22 = vpop.f32.mrb[12].mxu1 }
 0x9d4   :  { %v546_v23 = vadd.f32 %v539_v22, %v2046_v9  ;;  %v1731_v24 = vpop.f32.mrb[13].mxu1 }
 0x9d5   :  { %v542_v25 = vpop.f32.mrb[14].mxu1 }
 0x9d6   :  { %v2165_v26 = vadd.f32 %v551_v21, %v546_v23  ;;  %v547_v27 = vadd.f32 %v542_v25, %v2048_v12  ;;  %v1732_v28 = vpop.f32.mrb[15].mxu1 }
 0x9d8   :  { %v2168_v29 = vadd.f32 %v551_v21, %v547_v27  ;;  %v554_v30 = vsel %vm127_vm2, %v2165_v26, 0.0 }
 0x9d9   :  { %555 = vadd.xlane.f32.xlu1 %v554_v30 }
 0x9da   :  { %v557_v31 = vsel %vm127_vm2, %v2168_v29, 0.0 }
 0x9db   :  { %558 = vadd.xlane.f32.xlu0 %v557_v31 }
 0xa66   :  { %v556_v32 = vpop.xlane.xlu1 %555 }
 0xa67   :  { %v560_v33 = vmul.f32 0.03125, %v556_v32 }
 0xa68   :  { %v559_v9 = vpop.xlane.xlu0 %558 }
 0xa69   :  { %v562_v34 = vsub.f32 %v2165_v26, %v560_v33  ;;  %v561_v38 = vmul.f32 0.03125, %v559_v9 }
 0xa6b   :  { %v563_v39 = vsub.f32 %v2168_v29, %v561_v38  ;;  %v564_v12 = vmul.f32 %v562_v34, %v562_v34 }
 0xa6d   :  { %v566_v40 = vsel %vm127_vm2, %v564_v12, 0.0  ;;  %v565_v42 = vmul.f32 %v563_v39, %v563_v39 }
 0xa6e   :  { %567 = vadd.xlane.f32.xlu0 %v566_v40 }
 0xa6f   :  { %v569_v43 = vsel %vm127_vm2, %v565_v42, 0.0 }
 0xa70   :  { %570 = vadd.xlane.f32.xlu1 %v569_v43 }
 0xafb   :  { %v568_v48 = vpop.xlane.xlu0 %567 }
 0xafc   :  { %v572_v49 = vmul.f32 0.03125, %v568_v48 }
 0xafd   :  { %v571_v51 = vpop.xlane.xlu1 %570 }
 0xafe   :  { %v574_v52 = vadd.f32 1e-05, %v572_v49  ;;  %v573_v53 = vmul.f32 0.03125, %v571_v51 }
 0xb00   :  { %1910 = vrsqrt.f32 %v574_v52  ;;  %v575_v54 = vadd.f32 1e-05, %v573_v53 }
 0xb02   :  { %1912 = vrsqrt.f32 %v575_v54 }
 0xb0a   :  { %v1911_v59 = vpop.eup %1910 }
 0xb0b   :  { %v578_v60 = vmul.f32 %v1911_v59, %v562_v34 }
 0xb0c   :  { %v1913_v62 = vpop.eup %1912 }
 0xb0d   :  { %v584_v1 = vmul.f32 %v583_v56, %v578_v60  ;;  %v579_v2 = vmul.f32 %v1913_v62, %v563_v39  ;;  %v778_v39 = vsub.s32 7, %v2066_v35 }
 0xb0f   :  { %v585_v4 = vmul.f32 %v583_v56, %v579_v2  ;;  %v590_v5 = vadd.f32 %v589_v3, %v584_v1  ;;  %v779_v12 = vrot.slane %v2074_v37, %v778_v39  ;;  %v1874_v1 = vld [vmem:[%s2432_s5 + $0x10] sm:$0xff]   ;;  %v1875_v2 = vld [vmem:[%s2432_s5 + $0x18] sm:$0xff]  }
 0xb11   :  { %v591_v58 = vadd.f32 %v589_v3, %v585_v4 }
 0xb13   :  { %v592_v6 = vpack.c.bf16 %v591_v58, %v590_v5 }
 0xb15   :  { %1738 = vmatmul.mubr.msk.bf16.vlgmr.msra.gmra.mrb[12].mxu0 %vm127_vm2, %v592_v6 }
 0xb16   :  { %1765 = vmatprep.mubr.msk.bf16.mxu0 %vm1951_vm0, %v1950_v0  ;;  %1762 = vmatpush3.bf16.msra.mxu0 %v1874_v1 }
 0xb17   :  { %1763 = vmatprep.subr.bf16.mxu0 %v1950_v0 }
 0xb1a   :  { %1764 = vmatpush3.bf16.msra.mxu0 %v1875_v2 }
 0xb1b   :  { %1769 = vmatprep.subr.bf16.mxu0 %v1950_v0 }
 0xbe8   :  { %v650_v17 = vpop.f32.mrb[12].mxu0 }
 0xbe9   :  { %v651_v18 = vadd.f32 %v650_v17, %v600_v16  ;;  %v1739_v19 = vpop.f32.mrb[13].mxu0 }
 0xbea   :  { %v653_v21 = vpop.f32.mrb[14].mxu0 }
 0xbeb   :  { %v660_v22 = vmul.f32 0.70710677, %v651_v18  ;;  %v654_v23 = vadd.f32 %v653_v21, %v600_v16  ;;  %v1740_v24 = vpop.f32.mrb[15].mxu0  ;;  %v657_v31 = vmul.f32 0.5, %v651_v18  ;;  %v817_v18 = vrot.slane %v2264_v8, %v2079_v41 }
 0xbec   :  { %v829_v24 = vrot.slane %v2264_v8, %v174_v50 }
 0xbed   :  { %1914 = verf.f32 %v660_v22  ;;  %v661_v25 = vmul.f32 0.70710677, %v654_v23  ;;  %v658_v32 = vmul.f32 0.5, %v654_v23 }
 0xbef   :  { %1916 = verf.f32 %v661_v25 }
 0xbf7   :  { %v1915_v27 = vpop.eup %1914 }
 0xbf8   :  { %v664_v28 = vadd.f32 1.0, %v1915_v27 }
 0xbf9   :  { %v1917_v30 = vpop.eup %1916 }
 0xbfa   :  { %v665_v33 = vadd.f32 1.0, %v1917_v30  ;;  %v666_v9 = vmul.f32 %v664_v28, %v657_v31 }
 0xbfc   :  { %v667_v34 = vmul.f32 %v665_v33, %v658_v32 }
 0xbfe   :  { %v668_v38 = vpack.c.bf16 %v667_v34, %v666_v9 }
 0xc00   :  { %1758 = vmatmul.mubr.bf16.vlgmr.msra.gmra.mrb[16].mxu1 %v668_v38 }
 0xc01   :  { %1789 = vmatprep.mubr.msk.bf16.mxu1 %vm1951_vm0, %v1950_v0 }
 0xcd3   :  { %v767_v40 = vpop.f32.mrb[16].mxu1 }
 0xcd4   :  { %v774_v42 = vadd.f32 %v767_v40, %v2165_v26  ;;  %v1759_v43 = vpop.f32.mrb[17].mxu1 }
 0xcd5   :  { %v770_v44 = vpop.f32.mrb[18].mxu1 }
 0xcd6   :  { %v2240_v45 = vadd.f32 %v779_v12, %v774_v42  ;;  %v775_v46 = vadd.f32 %v770_v44, %v2168_v29  ;;  %v1760_v47 = vpop.f32.mrb[19].mxu1 }
 0xcd8   :  { %v2243_v48 = vadd.f32 %v779_v12, %v775_v46  ;;  %v782_v49 = vsel %vm127_vm2, %v2240_v45, 0.0 }
 0xcd9   :  { %783 = vadd.xlane.f32.xlu0 %v782_v49 }
 0xcda   :  { %v785_v51 = vsel %vm127_vm2, %v2243_v48, 0.0 }
 0xcdb   :  { %786 = vadd.xlane.f32.xlu1 %v785_v51 }
 0xd66   :  { %v784_v37 = vpop.xlane.xlu0 %783 }
 0xd67   :  { %v788_v52 = vmul.f32 0.03125, %v784_v37 }
 0xd68   :  { %v787_v26 = vpop.xlane.xlu1 %786 }
 0xd69   :  { %v790_v53 = vsub.f32 %v2240_v45, %v788_v52  ;;  %v789_v54 = vmul.f32 0.03125, %v787_v26 }
 0xd6b   :  { %v791_v56 = vsub.f32 %v2243_v48, %v789_v54  ;;  %v792_v29 = vmul.f32 %v790_v53, %v790_v53 }
 0xd6d   :  { %v794_v59 = vsel %vm127_vm2, %v792_v29, 0.0  ;;  %v793_v60 = vmul.f32 %v791_v56, %v791_v56 }
 0xd6e   :  { %795 = vadd.xlane.f32.xlu0 %v794_v59 }
 0xd6f   :  { %v797_v62 = vsel %vm127_vm2, %v793_v60, 0.0 }
 0xd70   :  { %798 = vadd.xlane.f32.xlu1 %v797_v62 }
 0xdfb   :  { %v796_v3 = vpop.xlane.xlu0 %795 }
 0xdfc   :  { %v800_v4 = vmul.f32 0.03125, %v796_v3 }
 0xdfd   :  { %v799_v5 = vpop.xlane.xlu1 %798 }
 0xdfe   :  { %v802_v58 = vadd.f32 1e-05, %v800_v4  ;;  %v801_v6 = vmul.f32 0.03125, %v799_v5 }
 0xe00   :  { %1918 = vrsqrt.f32 %v802_v58  ;;  %v803_v7 = vadd.f32 1e-05, %v801_v6 }
 0xe02   :  { %1920 = vrsqrt.f32 %v803_v7 }
 0xe0a   :  { %v1919_v11 = vpop.eup %1918 }
 0xe0b   :  { %v806_v13 = vmul.f32 %v1919_v11, %v790_v53 }
 0xe0c   :  { %v1921_v14 = vpop.eup %1920 }
 0xe0d   :  { %v812_v16 = vmul.f32 %v811_v10, %v806_v13  ;;  %v807_v17 = vmul.f32 %v1921_v14, %v791_v56 }
 0xe0f   :  { %v813_v19 = vmul.f32 %v811_v10, %v807_v17  ;;  %v818_v21 = vadd.f32 %v817_v18, %v812_v16 }
 0xe11   :  { %v819_v22 = vadd.f32 %v817_v18, %v813_v19 }
 0xe13   :  { %v820_v23 = vpack.c.bf16 %v819_v22, %v818_v21 }
 0xe15   :  { %1766 = vmatmul.mubr.msk.bf16.vlgmr.msra.gmra.mrb[16].mxu0 %vm127_vm2, %v820_v23 }
 0xe16   :  { %1771 = vmatprep.mubr.msk.bf16.mxu0 %vm1951_vm0, %v1950_v0 }
 0xee8   :  { %v879_v25 = vpop.f32.mrb[16].mxu0 }
 0xee9   :  { %v1767_v27 = vpop.f32.mrb[17].mxu0  ;;  %v880_v30 = vadd.f32 %v879_v25, %v829_v24 }
 0xeea   :  { %v882_v28 = vpop.f32.mrb[18].mxu0 }
 0xeeb   :  { %v883_v31 = vadd.f32 %v882_v28, %v829_v24  ;;  %v1768_v32 = vpop.f32.mrb[19].mxu0 }
 0xeed   :  { %v2276_v33 = vpack.c.bf16 %v883_v31, %v880_v30 }
 0xeef   :  { %888 = vrot.lane.b32.xlu0 %v2276_v33, %s1952_s30 }
 0xef3   :  { %1009 = vrot.lane.b32.xlu0 %v2276_v33, %s1953_s11 }
 0xef7   :  { %1007 = vrot.lane.b32.xlu0 %v2276_v33, %s1954_s12 }
 0xf61   :  { %v889_v9 = vpop.permute.xlu0 %888 }
 0xf62   :  { %v894_v50 = vsel %vm236_vm3, %v889_v9, 0 }
 0xf63   :  { %1770 = vmatpush3.bf16.xpose.msra.mxu0 %v894_v50 }
 0xf64   :  { %1775 = vmatprep.subr.bf16.mxu0 %v1950_v0 }
 0xf65   :  { %v1010_v5 = vpop.permute.xlu0 %1009 }
 0xf66   :  { %v1015_v6 = vsel %vm236_vm3, %v1010_v5, 0 }
 0xf69   :  { %v1008_v7 = vpop.permute.xlu0 %1007 }
 0xf6a   :  { %1772 = vmatmul.mubr.msk.bf16.vlgmr.msra.gmra.mrb[20].mxu0 %vm236_vm3, %v2276_v33 }
 0xf6b   :  { %1777 = vmatprep.mubr.msk.bf16.mxu0 %vm1951_vm0, %v1950_v0 }
0x103d   :  { %v930_v34 = vpop.f32.mrb[20].mxu0 }
0x103e   :  { %v931_v38 = vadd.f32 %v930_v34, %v2107_v61  ;;  %v1773_v12 = vpop.f32.mrb[21].mxu0 }
0x103f   :  { %v933_v40 = vpop.f32.mrb[22].mxu0 }
0x1040   :  { %v934_v42 = vadd.f32 %v933_v40, %v2112_v63  ;;  %v1774_v43 = vpop.f32.mrb[23].mxu0  ;;  %v937_v44 = vsel %vm236_vm3, %v931_v38, -inf }
0x1041   :  { %938 = vmax.xlane.f32.xlu1 %v937_v44 }
0x1042   :  { %v940_v46 = vsel %vm236_vm3, %v934_v42, -inf }
0x1045   :  { %941 = vmax.xlane.f32.xlu1 %v940_v46 }
0x10ce   :  { %v939_v47 = vpop.xlane.xlu1 %938 }
0x10cf   :  { %v943_v49 = vsub.f32 %v931_v38, %v939_v47  ;;  %v1877_v47 = vld [vmem:[%s2435_s6 + $0x18] sm:$0xff]  }
0x10d1   :  { %v945_v51 = vmul.f32 1.442695, %v943_v49 }
0x10d2   :  { %v942_v37 = vpop.xlane.xlu1 %941 }
0x10d3   :  { %1922 = vpow2.f32 %v945_v51  ;;  %v944_v52 = vsub.f32 %v934_v42, %v942_v37 }
0x10d5   :  { %v947_v26 = vmul.f32 1.442695, %v944_v52 }
0x10d7   :  { %1924 = vpow2.f32 %v947_v26 }
0x10dd   :  { %v1923_v53 = vpop.eup %1922 }
0x10de   :  { %v949_v54 = vsel %vm236_vm3, %v1923_v53, 0.0 }
0x10df   :  { %950 = vadd.xlane.f32.xlu1 %v949_v54 }
0x10e1   :  { %v1925_v56 = vpop.eup %1924 }
0x10e2   :  { %v952_v29 = vsel %vm236_vm3, %v1925_v56, 0.0 }
0x10e3   :  { %953 = vadd.xlane.f32.xlu1 %v952_v29 }
0x10f4   :  { %960 = vrot.lane.b32.xlu1 %v2276_v33, %s1955_s3 }
0x116c   :  { %v951_v59 = vpop.xlane.xlu1 %950 }
0x116d   :  { %1926 = vrcp.f32 %v951_v59 }
0x1170   :  { %v954_v60 = vpop.xlane.xlu1 %953 }
0x1171   :  { %1928 = vrcp.f32 %v954_v60 }
0x1174   :  { %v961_v62 = vpop.permute.xlu1 %960 }
0x1175   :  { %1776 = vmatpush3.bf16.msra.mxu0 %v961_v62  ;;  %v1205_v62 = vrot.slane %v2264_v8, %v550_v20 }
0x1176   :  { %1781 = vmatprep.subr.bf16.mxu0 %v1950_v0 }
0x1177   :  { %v1927_v1 = vpop.eup %1926 }
0x1178   :  { %v957_v3 = vmul.f32 %v1927_v1, %v1923_v53 }
0x117b   :  { %v1929_v2 = vpop.eup %1928 }
0x117c   :  { %v958_v4 = vmul.f32 %v1929_v2, %v1925_v56 }
0x117e   :  { %v959_v58 = vpack.c.bf16 %v958_v4, %v957_v3 }
0x1180   :  { %1778 = vmatmul.mubr.msk.bf16.vlgmr.msra.gmra.mrb[24].mxu0 %vm236_vm3, %v959_v58 }
0x1181   :  { %1782 = vmatpush3.bf16.xpose.msra.mxu0 %v1015_v6  ;;  %1783 = vmatprep.mubr.msk.bf16.mxu0 %vm1951_vm0, %v1950_v0 }
0x1182   :  { %1793 = vmatprep.subr.bf16.mxu0 %v1950_v0 }
0x1188   :  { %1784 = vmatmul.mubr.msk.bf16.vlgmr.msra.gmra.mrb[28].mxu0 %vm236_vm3, %v1008_v7 }
0x1189   :  { %1797 = vmatprep.mubr.msk.bf16.mxu0 %vm1951_vm0, %v1950_v0 }
0x1253   :  { %v1000_v10 = vpop.f32.mrb[24].mxu0 }
0x1254   :  { %v1779_v11 = vpop.f32.mrb[25].mxu0 }
0x1255   :  { %v1003_v13 = vpop.f32.mrb[26].mxu0 }
0x1256   :  { %v1780_v14 = vpop.f32.mrb[27].mxu0 }
0x125b   :  { %v1051_v16 = vpop.f32.mrb[28].mxu0 }
0x125c   :  { %v1052_v17 = vadd.f32 %v1051_v16, %v2107_v61  ;;  %v1785_v18 = vpop.f32.mrb[29].mxu0 }
0x125d   :  { %v1054_v19 = vpop.f32.mrb[30].mxu0 }
0x125e   :  { %v1055_v21 = vadd.f32 %v1054_v19, %v2112_v63  ;;  %v1786_v22 = vpop.f32.mrb[31].mxu0  ;;  %v1058_v23 = vsel %vm236_vm3, %v1052_v17, -inf }
0x125f   :  { %1059 = vmax.xlane.f32.xlu0 %v1058_v23  ;;  %v1878_v22 = vld [vmem:[%s2436_s7 + $0x10] sm:$0xff]   ;;  %v1879_v23 = vld [vmem:[%s2436_s7 + $0x18] sm:$0xff]  }
0x1260   :  { %v1061_v24 = vsel %vm236_vm3, %v1055_v21, -inf }
0x1261   :  { %1062 = vmax.xlane.f32.xlu1 %v1061_v24  ;;  %v1880_v24 = vld [vmem:[%s2437_s8 + $0x40] sm:$0xff]  }
0x12ec   :  { %v1060_v25 = vpop.xlane.xlu0 %1059 }
0x12ed   :  { %v1064_v27 = vsub.f32 %v1052_v17, %v1060_v25  ;;  %v1881_v25 = vld [vmem:[%s2437_s8 + $0x48] sm:$0xff]  }
0x12ee   :  { %v1063_v28 = vpop.xlane.xlu1 %1062 }
0x12ef   :  { %v1066_v30 = vmul.f32 1.442695, %v1064_v27  ;;  %v1065_v31 = vsub.f32 %v1055_v21, %v1063_v28 }
0x12f1   :  { %1930 = vpow2.f32 %v1066_v30  ;;  %v1068_v32 = vmul.f32 1.442695, %v1065_v31 }
0x12f3   :  { %1932 = vpow2.f32 %v1068_v32 }
0x12fb   :  { %v1931_v61 = vpop.eup %1930 }
0x12fc   :  { %v1070_v9 = vsel %vm236_vm3, %v1931_v61, 0.0 }
0x12fd   :  { %v1933_v50 = vpop.eup %1932  ;;  %1071 = vadd.xlane.f32.xlu0 %v1070_v9  ;;  %v1237_v9 = vrot.slane %v2264_v8, %v582_v55  ;;  %v1882_v55 = vld [vmem:[%s2437_s8 + $0x50] sm:$0xff]  }
0x12fe   :  { %v1073_v63 = vsel %vm236_vm3, %v1933_v50, 0.0 }
0x1301   :  { %1074 = vadd.xlane.f32.xlu0 %v1073_v63 }
0x1317   :  { %1081 = vrot.lane.b32.xlu0 %v2276_v33, %s1956_s17  ;;  %v1876_v33 = vld [vmem:[%s2435_s6 + $0x10] sm:$0xff]  }
0x1318   :  { %1794 = vmatpush3.bf16.msra.mxu0 %v1876_v33  ;;  %v1884_v33 = vld [vmem:[%s2437_s8 + $0x60] sm:$0xff]  }
0x1319   :  { %1795 = vmatprep.subr.bf16.mxu0 %v1950_v0 }
0x131c   :  { %1796 = vmatpush3.bf16.msra.mxu0 %v1877_v47  ;;  %v1885_v47 = vld [vmem:[%s2437_s8 + $0x68] sm:$0xff]  }
0x131d   :  { %1809 = vmatprep.subr.bf16.mxu0 %v1950_v0 }
0x138a   :  { %v1072_v34 = vpop.xlane.xlu0 %1071 }
0x138b   :  { %1934 = vrcp.f32 %v1072_v34 }
0x138e   :  { %v1075_v38 = vpop.xlane.xlu0 %1074 }
0x138f   :  { %1936 = vrcp.f32 %v1075_v38 }
0x1392   :  { %v1082_v12 = vpop.permute.xlu0 %1081 }
0x1393   :  { %1788 = vmatpush3.bf16.msra.mxu1 %v1082_v12 }
0x1394   :  { %1801 = vmatprep.subr.bf16.mxu1 %v1950_v0 }
0x1395   :  { %v1935_v40 = vpop.eup %1934 }
0x1396   :  { %v1078_v43 = vmul.f32 %v1935_v40, %v1931_v61  ;;  %v1243_v40 = vrot.slane %v2264_v8, %v588_v57  ;;  %v1883_v57 = vld [vmem:[%s2437_s8 + $0x58] sm:$0xff]  }
0x1399   :  { %v1937_v42 = vpop.eup %1936 }
0x139a   :  { %v1079_v44 = vmul.f32 %v1937_v42, %v1933_v50 }
0x139c   :  { %v1080_v46 = vpack.c.bf16 %v1079_v44, %v1078_v43 }
0x139e   :  { %1790 = vmatmul.mubr.msk.bf16.vlgmr.msra.gmra.mrb[20].mxu1 %vm236_vm3, %v1080_v46 }
0x139f   :  { %1805 = vmatprep.mubr.msk.bf16.mxu1 %vm1951_vm0, %v1950_v0  ;;  %1802 = vmatpush3.bf16.msra.mxu1 %v1878_v22 }
0x13a0   :  { %1803 = vmatprep.subr.bf16.mxu1 %v1950_v0 }
0x13a3   :  { %1804 = vmatpush3.bf16.msra.mxu1 %v1879_v23 }
0x13a4   :  { %1829 = vmatprep.subr.bf16.mxu1 %v1950_v0 }
0x1471   :  { %v1121_v49 = vpop.f32.mrb[20].mxu1 }
0x1472   :  { %v1791_v51 = vpop.f32.mrb[21].mxu1 }
0x1473   :  { %v1124_v37 = vpop.f32.mrb[22].mxu1  ;;  %v1887_v51 = vld [vmem:[%s2437_s8 + $0x78] sm:$0xff]  }
0x1474   :  { %v1850_v52 = vpack.i.bf16 %v1124_v37, %v1121_v49  ;;  %v1792_v26 = vpop.f32.mrb[23].mxu1  ;;  %v1886_v49 = vld [vmem:[%s2437_s8 + $0x70] sm:$0xff]   ;;  %v1255_v37 = vrot.slane %v2264_v8, %v599_v15  ;;  %v1434_v15 = vrot.slane %v2264_v8, %v778_v39 }
0x1476   :  { %1851 = vrot.lane.b32.xlu1 %v1850_v52, %s1957_s22 }
0x14e8   :  { %v1852_v53 = vpop.permute.xlu1 %1851 }
0x14e9   :  { %v1854_v54 = vunpack.i.h.bf16 %v1852_v53  ;;  %v1853_v56 = vunpack.i.l.bf16 %v1852_v53 }
0x14eb   :  { %v1137_v29 = vsel %vm236_vm3, %v1003_v13, %v1854_v54  ;;  %v1136_v59 = vsel %vm236_vm3, %v1000_v10, %v1853_v56 }
0x14ec   :  { %v1138_v60 = vpack.c.bf16 %v1137_v29, %v1136_v59 }
0x14ee   :  { %1798 = vmatmul.mubr.msk.bf16.vlgmr.msra.gmra.mrb[32].mxu0 %vm127_vm2, %v1138_v60 }
0x14ef   :  { %1825 = vmatprep.mubr.msk.bf16.mxu0 %vm1951_vm0, %v1950_v0  ;;  %1810 = vmatpush3.bf16.msra.mxu0 %v1880_v24 }
0x14f0   :  { %1811 = vmatprep.subr.bf16.mxu0 %v1950_v0 }
0x14f3   :  { %1812 = vmatpush3.bf16.msra.mxu0 %v1881_v25 }
0x14f4   :  { %1813 = vmatprep.subr.bf16.mxu0 %v1950_v0 }
0x14f7   :  { %1814 = vmatpush3.bf16.msra.mxu0 %v1882_v55 }
0x14f8   :  { %1815 = vmatprep.subr.bf16.mxu0 %v1950_v0 }
0x14fb   :  { %1816 = vmatpush3.bf16.msra.mxu0 %v1883_v57 }
0x14fc   :  { %1817 = vmatprep.subr.bf16.mxu0 %v1950_v0 }
0x14ff   :  { %1818 = vmatpush3.bf16.msra.mxu0 %v1884_v33 }
0x1500   :  { %1819 = vmatprep.subr.bf16.mxu0 %v1950_v0 }
0x1503   :  { %1820 = vmatpush3.bf16.msra.mxu0 %v1885_v47 }
0x1504   :  { %1821 = vmatprep.subr.bf16.mxu0 %v1950_v0 }
0x1507   :  { %1822 = vmatpush3.bf16.msra.mxu0 %v1886_v49 }
0x1508   :  { %1823 = vmatprep.subr.bf16.mxu0 %v1950_v0 }
0x150b   :  { %1824 = vmatpush3.bf16.msra.mxu0 %v1887_v51 }
0x15c1   :  { %v1193_v1 = vpop.f32.mrb[32].mxu0 }
0x15c2   :  { %v1200_v2 = vadd.f32 %v1193_v1, %v2240_v45  ;;  %v1799_v3 = vpop.f32.mrb[33].mxu0 }
0x15c3   :  { %v1196_v4 = vpop.f32.mrb[34].mxu0 }
0x15c4   :  { %v2337_v5 = vadd.f32 %v1205_v62, %v1200_v2  ;;  %v1201_v58 = vadd.f32 %v1196_v4, %v2243_v48  ;;  %v1800_v6 = vpop.f32.mrb[35].mxu0 }
0x15c6   :  { %v2340_v7 = vadd.f32 %v1205_v62, %v1201_v58  ;;  %v1208_v10 = vsel %vm127_vm2, %v2337_v5, 0.0 }
0x15c7   :  { %1209 = vadd.xlane.f32.xlu1 %v1208_v10 }
0x15c8   :  { %v1211_v11 = vsel %vm127_vm2, %v2340_v7, 0.0 }
0x15c9   :  { %1212 = vadd.xlane.f32.xlu0 %v1211_v11 }
0x1654   :  { %v1210_v20 = vpop.xlane.xlu1 %1209 }
0x1655   :  { %v1214_v13 = vmul.f32 0.03125, %v1210_v20 }
0x1656   :  { %v1213_v45 = vpop.xlane.xlu0 %1212 }
0x1657   :  { %v1216_v14 = vsub.f32 %v2337_v5, %v1214_v13  ;;  %v1215_v16 = vmul.f32 0.03125, %v1213_v45 }
0x1659   :  { %v1217_v17 = vsub.f32 %v2340_v7, %v1215_v16  ;;  %v1218_v48 = vmul.f32 %v1216_v14, %v1216_v14 }
0x165b   :  { %v1220_v18 = vsel %vm127_vm2, %v1218_v48, 0.0  ;;  %v1219_v19 = vmul.f32 %v1217_v17, %v1217_v17 }
0x165c   :  { %1221 = vadd.xlane.f32.xlu0 %v1220_v18 }
0x165d   :  { %v1223_v21 = vsel %vm127_vm2, %v1219_v19, 0.0 }
0x165e   :  { %1224 = vadd.xlane.f32.xlu1 %v1223_v21 }
0x16e9   :  { %v1222_v27 = vpop.xlane.xlu0 %1221 }
0x16ea   :  { %v1226_v28 = vmul.f32 0.03125, %v1222_v27 }
0x16eb   :  { %v1225_v30 = vpop.xlane.xlu1 %1224 }
0x16ec   :  { %v1228_v31 = vadd.f32 1e-05, %v1226_v28  ;;  %v1227_v32 = vmul.f32 0.03125, %v1225_v30  ;;  %v1888_v28 = vld [vmem:[%s2438_s9] sm:$0xff]   ;;  %v1889_v30 = vld [vmem:[%s2438_s9 + $0x8] sm:$0xff]  }
0x16ee   :  { %1938 = vrsqrt.f32 %v1228_v31  ;;  %v1229_v61 = vadd.f32 1e-05, %v1227_v32 }
0x16f0   :  { %1940 = vrsqrt.f32 %v1229_v61 }
0x16f8   :  { %v1939_v50 = vpop.eup %1938 }
0x16f9   :  { %v1232_v63 = vmul.f32 %v1939_v50, %v1216_v14 }
0x16fa   :  { %v1941_v34 = vpop.eup %1940 }
0x16fb   :  { %v1238_v38 = vmul.f32 %v1237_v9, %v1232_v63  ;;  %v1233_v12 = vmul.f32 %v1941_v34, %v1217_v17  ;;  %v126_v34 = vld [vmem:[%s2433_s4 + $0x10] sm:$0x3] }
0x16fd   :  { %v1239_v42 = vmul.f32 %v1237_v9, %v1233_v12  ;;  %v1244_v43 = vadd.f32 %v1243_v40, %v1238_v38  ;;  %v1466_v38 = vrot.slane %v126_v34, %v2069_v36 }
0x16ff   :  { %v1245_v44 = vadd.f32 %v1243_v40, %v1239_v42 }
0x1701   :  { %v1246_v46 = vpack.c.bf16 %v1245_v44, %v1244_v43  ;;  %v1472_v44 = vrot.slane %v126_v34, %v2079_v41 }
0x1703   :  { %1806 = vmatmul.mubr.msk.bf16.vlgmr.msra.gmra.mrb[24].mxu1 %vm127_vm2, %v1246_v46 }
0x1704   :  { %1833 = vmatprep.mubr.msk.bf16.mxu1 %vm1951_vm0, %v1950_v0  ;;  %1830 = vmatpush3.bf16.msra.mxu1 %v1888_v28 }
0x1705   :  { %1831 = vmatprep.subr.bf16.mxu1 %v1950_v0 }
0x1708   :  { %1832 = vmatpush3.bf16.msra.mxu1 %v1889_v30 }
0x17d6   :  { %v1305_v52 = vpop.f32.mrb[24].mxu1 }
0x17d7   :  { %v1306_v26 = vadd.f32 %v1305_v52, %v1255_v37  ;;  %v1807_v53 = vpop.f32.mrb[25].mxu1 }
0x17d8   :  { %v1308_v54 = vpop.f32.mrb[26].mxu1 }
0x17d9   :  { %v1314_v56 = vmul.f32 0.70710677, %v1306_v26  ;;  %v1309_v29 = vadd.f32 %v1308_v54, %v1255_v37  ;;  %v1808_v59 = vpop.f32.mrb[27].mxu1  ;;  %v1312_v3 = vmul.f32 0.5, %v1306_v26 }
0x17db   :  { %1942 = verf.f32 %v1314_v56  ;;  %v1315_v60 = vmul.f32 0.70710677, %v1309_v29  ;;  %v1313_v4 = vmul.f32 0.5, %v1309_v29 }
0x17dd   :  { %1944 = verf.f32 %v1315_v60 }
0x17e5   :  { %v1943_v62 = vpop.eup %1942 }
0x17e6   :  { %v1318_v1 = vadd.f32 1.0, %v1943_v62 }
0x17e7   :  { %v1945_v2 = vpop.eup %1944 }
0x17e8   :  { %v1319_v58 = vadd.f32 1.0, %v1945_v2  ;;  %v1320_v6 = vmul.f32 %v1318_v1, %v1312_v3 }
0x17ea   :  { %v1321_v10 = vmul.f32 %v1319_v58, %v1313_v4 }
0x17ec   :  { %v1322_v11 = vpack.c.bf16 %v1321_v10, %v1320_v6 }
0x17ee   :  { %1826 = vmatmul.mubr.bf16.vlgmr.msra.gmra.mrb[36].mxu0 %v1322_v11 }
0x18c1   :  { %v1422_v20 = vpop.f32.mrb[36].mxu0 }
0x18c2   :  { %v1429_v13 = vadd.f32 %v1422_v20, %v2337_v5  ;;  %v1827_v45 = vpop.f32.mrb[37].mxu0 }
0x18c3   :  { %v1425_v14 = vpop.f32.mrb[38].mxu0 }
0x18c4   :  { %v1430_v16 = vadd.f32 %v1425_v14, %v2340_v7  ;;  %v1828_v17 = vpop.f32.mrb[39].mxu0  ;;  %v1435_v48 = vadd.f32 %v1434_v15, %v1429_v13 }
0x18c6   :  { %v1437_v18 = vsel %vm127_vm2, %v1435_v48, 0.0  ;;  %v1436_v19 = vadd.f32 %v1434_v15, %v1430_v16 }
0x18c7   :  { %1438 = vadd.xlane.f32.xlu0 %v1437_v18 }
0x18c8   :  { %v1440_v21 = vsel %vm127_vm2, %v1436_v19, 0.0 }
0x18c9   :  { %1441 = vadd.xlane.f32.xlu1 %v1440_v21 }
0x1954   :  { %v1439_v22 = vpop.xlane.xlu0 %1438 }
0x1955   :  { %v1443_v35 = vmul.f32 0.03125, %v1439_v22 }
0x1956   :  { %v1442_v23 = vpop.xlane.xlu1 %1441 }
0x1957   :  { %v1445_v39 = vsub.f32 %v1435_v48, %v1443_v35  ;;  %v1444_v8 = vmul.f32 0.03125, %v1442_v23 }
0x1959   :  { %v1446_v24 = vsub.f32 %v1436_v19, %v1444_v8  ;;  %v1447_v5 = vmul.f32 %v1445_v39, %v1445_v39 }
0x195b   :  { %v1449_v25 = vsel %vm127_vm2, %v1447_v5, 0.0  ;;  %v1448_v27 = vmul.f32 %v1446_v24, %v1446_v24 }
0x195c   :  { %1450 = vadd.xlane.f32.xlu0 %v1449_v25 }
0x195d   :  { %v1452_v7 = vsel %vm127_vm2, %v1448_v27, 0.0 }
0x195e   :  { %1453 = vadd.xlane.f32.xlu1 %v1452_v7 }
0x19e9   :  { %v1451_v31 = vpop.xlane.xlu0 %1450 }
0x19ea   :  { %v1455_v32 = vmul.f32 0.03125, %v1451_v31 }
0x19eb   :  { %v1454_v61 = vpop.xlane.xlu1 %1453 }
0x19ec   :  { %v1457_v9 = vadd.f32 1e-05, %v1455_v32  ;;  %v1456_v50 = vmul.f32 0.03125, %v1454_v61 }
0x19ee   :  { %1946 = vrsqrt.f32 %v1457_v9  ;;  %v1458_v63 = vadd.f32 1e-05, %v1456_v50 }
0x19f0   :  { %1948 = vrsqrt.f32 %v1458_v63 }
0x19f8   :  { %v1947_v12 = vpop.eup %1946 }
0x19f9   :  { %v1461_v40 = vmul.f32 %v1947_v12, %v1445_v39 }
0x19fa   :  { %v1949_v42 = vpop.eup %1948 }
0x19fb   :  { %v1467_v43 = vmul.f32 %v1466_v38, %v1461_v40  ;;  %v1462_v0 = vmul.f32 %v1949_v42, %v1446_v24 }
0x19fd   :  { %v1468_v46 = vmul.f32 %v1466_v38, %v1462_v0  ;;  %v1473_v55 = vadd.f32 %v1472_v44, %v1467_v43 }
0x19ff   :  { %v1474_v57 = vadd.f32 %v1472_v44, %v1468_v46 }
0x1a01   :  { %v1475_v33 = vpack.c.bf16 %v1474_v57, %v1473_v55 }
0x1a03   :  { %1834 = vmatmul.mubr.msk.bf16.vlgmr.msra.gmra.mrb[28].mxu1 %vm127_vm2, %v1475_v33 }
0x1ad6   :  { %v1529_v47 = vpop.f32.mrb[28].mxu1 }
0x1ad7   :  { %1536 = vst [vmem:[%s2439_s10] sm:$0xff] %v1529_v47  ;;  %v1835_v49 = vpop.f32.mrb[29].mxu1 }
0x1ad8   :  { %v1532_v36 = vpop.f32.mrb[30].mxu1 }
0x1ad9   :  { %1537 = vst [vmem:[%s2439_s10 + $0x8] sm:$0xff] %v1532_v36  ;;  %v1836_v51 = vpop.f32.mrb[31].mxu1 }

</bundles_post_ra>
